<compile_context>
chip_gen: v6e
topology: v6e:2x2x1
jax: 0.10.0
libtpu: 0.0.40
codegen_flags: <defaults>
</compile_context>

<pallas_src>
import jax
import jax.numpy as jnp
from jax.experimental import pallas as pl
from jax.experimental.pallas import tpu as pltpu

# ---------------- config (small, shapes consistent with the module) ----------------
VOCAB = 128
HIDDEN = 32
N_HEADS = 4
HEAD_DIM = HIDDEN // N_HEADS
N_LAYERS = 2
INTERMEDIATE = 64
MAX_POS = 16
N_CLASSES = 3
CLS_PAD = 128          # lane-dense padded classifier width (sliced to N_CLASSES outside)
LN_EPS = 1e-12


# ---------------- fused Pallas kernel (one grid step = BT sequences) ----------------
def _bert_fused_kernel(word_ref, nmask_ref,
                       pos_ref, type_ref, glob_ref,
                       wqkv_ref, bqkv_ref, wo_ref, ln_ref,
                       w1_ref, b1_ref, w2_ref,
                       pool_w_ref, cls_w_ref, cls_b_ref,
                       out_ref):
    f32, bf16 = jnp.float32, jnp.bfloat16
    bt, S, H = word_ref.shape
    rows = bt * S

    def ln(x, g, b):
        # One-pass moments (var = E[x^2] - E[x]^2): saves one XLU reduce per LN.
        m = jnp.mean(x, axis=-1, keepdims=True)
        m2 = jnp.mean(x * x, axis=-1, keepdims=True)
        var = jnp.maximum(m2 - m * m, 0.0)
        return (x - m) * jax.lax.rsqrt(var + LN_EPS) * g + b

    def mm(a, w):
        # bf16 operands on the MXU, f32 accumulation; elementwise math stays f32.
        return jnp.dot(a.astype(bf16), w, preferred_element_type=f32)

    glob = glob_ref[...]                                              # (3, H) f32
    emb_g, emb_b, pool_b = glob[0:1, :], glob[1:2, :], glob[2:3, :]

    # Embedding combine (word + position + token-type 0) fused into the kernel.
    x = word_ref[...] + pos_ref[0:S, :] + type_ref[0:1, :]            # (bt, S, H)
    h = ln(x, emb_g, emb_b).reshape(rows, H)                          # (bt*S, H)

    # Additive attention mask (precomputed f32 on host), tiled head-major to match
    # the head-batched score tensor.
    nm = nmask_ref[...]                                               # (bt, 1, S)
    nm_heads = jnp.concatenate([nm] * N_HEADS, axis=0)                # (NH*bt, 1, S)

    for l in range(N_LAYERS):
        lv = ln_ref[l]                                                # (6, H) f32
        bo, ln1_g, ln1_b = lv[0:1, :], lv[1:2, :], lv[2:3, :]
        b2, ln2_g, ln2_b = lv[3:4, :], lv[4:5, :], lv[5:6, :]

        # Fused QKV projection (1/sqrt(head_dim) already folded into Wq at init).
        qkv = mm(h, wqkv_ref[l]) + bqkv_ref[l]                        # (bt*S, 3H)
        qkv3 = qkv.reshape(bt, S, 3 * H)

        # Head-batched attention: stack heads on the leading (batch) axis so one
        # batched dot_general covers all heads and all bt sequences at once.
        def heads(base):
            return jnp.concatenate(
                [qkv3[:, :, base + hd * HEAD_DIM: base + (hd + 1) * HEAD_DIM]
                 for hd in range(N_HEADS)], axis=0)                   # (NH*bt, S, Dh)
        q_h, k_h, v_h = heads(0), heads(H), heads(2 * H)

        s = jnp.einsum('bqd,bkd->bqk', q_h.astype(bf16), k_h.astype(bf16),
                       preferred_element_type=f32)                    # (NH*bt, S, S)
        s = s + nm_heads
        s = s - jnp.max(s, axis=-1, keepdims=True)
        p = jnp.exp(s)
        # EUP approx reciprocal (~2^-12 rel err) keeps the divide off the VPU path.
        p = p * pl.reciprocal(jnp.sum(p, axis=-1, keepdims=True), approx=True)
        ctx = jnp.einsum('bqk,bkd->bqd', p.astype(bf16), v_h.astype(bf16),
                         preferred_element_type=f32)                  # (NH*bt, S, Dh)

        # Head merge folded into the output projection: per-head partial matmuls
        # against the matching Wo row-block (no lane concat needed).
        wo_l = wo_ref[l]                                              # (H, H) bf16
        attn = mm(ctx[0:bt].reshape(rows, HEAD_DIM), wo_l[0:HEAD_DIM, :])
        for hd in range(1, N_HEADS):
            attn = attn + mm(ctx[hd * bt:(hd + 1) * bt].reshape(rows, HEAD_DIM),
                             wo_l[hd * HEAD_DIM:(hd + 1) * HEAD_DIM, :])
        attn = attn + bo
        h = ln(attn + h, ln1_g, ln1_b)                                # residual + LN fused

        # Feed-forward.
        ffn = mm(h, w1_ref[l]) + b1_ref[l]
        # TODO(synk): HF BERT uses exact (erf) GELU; tanh approximation used here.
        ffn = jax.nn.gelu(ffn, approximate=True)
        ffn = mm(ffn, w2_ref[l]) + b2
        h = ln(ffn + h, ln2_g, ln2_b)                                 # residual + LN fused

    # BERT pooler on every [CLS] row in the block -> classifier head.
    cls = h.reshape(bt, S, H)[:, 0, :]                                # (bt, H)
    pooled = jnp.tanh(mm(cls, pool_w_ref[...]) + pool_b)
    # nn.Dropout(p=0.3): identity in eval mode.
    # TODO(synk): train-mode stochastic dropout masking not applied here.
    logits = mm(pooled, cls_w_ref[...]) + cls_b_ref[...]              # (bt, CLS_PAD)
    out_ref[0, :, :] = logits.astype(out_ref.dtype)


# ---------------- parameter init (deterministic, synthetic) ----------------
def init_params(key):
    keys = iter(jax.random.split(key, 16))

    def nrm(shape):
        return jax.random.normal(next(keys), shape, jnp.float32) * 0.02

    bf16 = jnp.bfloat16
    scale = 1.0 / float(HEAD_DIM) ** 0.5

    # Fused Wq|Wk|Wv with the 1/sqrt(head_dim) attention scale folded into Wq.
    wqkv = nrm((N_LAYERS, HIDDEN, 3 * HIDDEN)).at[:, :, :HIDDEN].multiply(scale)
    bqkv = jnp.zeros((N_LAYERS, 1, 3 * HIDDEN), jnp.float32)   # q-bias shares the fold (zero here)

    # Consolidated per-layer small vectors; rows: 0=bo 1=ln1_g 2=ln1_b 3=b2 4=ln2_g 5=ln2_b.
    ln_vecs = (jnp.zeros((N_LAYERS, 6, HIDDEN), jnp.float32)
               .at[:, 1, :].set(1.0).at[:, 4, :].set(1.0))
    # Global small vectors; rows: 0=emb_ln_gamma 1=emb_ln_beta 2=pooler_bias.
    glob_vecs = jnp.zeros((3, HIDDEN), jnp.float32).at[0, :].set(1.0)

    cls_w = nrm((HIDDEN, N_CLASSES))
    cls_w_pad = jnp.zeros((HIDDEN, CLS_PAD), jnp.float32).at[:, :N_CLASSES].set(cls_w)

    return {
        "word_emb": nrm((VOCAB, HIDDEN)),
        "pos_emb": nrm((MAX_POS, HIDDEN)),
        "type_emb": nrm((2, HIDDEN)),
        "glob_vecs": glob_vecs,
        # bf16 matmul weights (MXU path); biases / LN vectors stay f32.
        "wqkv": wqkv.astype(bf16),
        "bqkv": bqkv,
        "wo": nrm((N_LAYERS, HIDDEN, HIDDEN)).astype(bf16),
        "ln_vecs": ln_vecs,
        "w1": nrm((N_LAYERS, HIDDEN, INTERMEDIATE)).astype(bf16),
        "b1": jnp.zeros((N_LAYERS, 1, INTERMEDIATE), jnp.float32),
        "w2": nrm((N_LAYERS, INTERMEDIATE, HIDDEN)).astype(bf16),
        "pool_w": nrm((HIDDEN, HIDDEN)).astype(bf16),
        "cls_w_pad": cls_w_pad.astype(bf16),
        "cls_b_pad": jnp.zeros((1, CLS_PAD), jnp.float32),
    }


def _const_map(ndim):
    return lambda g: (0,) * ndim


def _choose_block_batch(B, S):
    """Sequences per grid step: keep >=2 parallel steps for v7x's 2 TensorCores,
    cap rows/step near 128, and require B % bt == 0."""
    if B <= 1:
        return 1
    bt = max(1, min(B // 2, max(1, 128 // S)))
    while B % bt:
        bt -= 1
    return bt


# ---------------- forward (embedding gather in XLA, everything else fused) ----------------
def bert_classifier_forward(params, input_ids, attention_mask):
    B, S = input_ids.shape
    bt = _choose_block_batch(B, S)
    G = B // bt

    # Embedding gather is glue (tiny XLA gather); the add with pos/type embeddings
    # happens inside the kernel. token_type_ids are all zero.
    word = jnp.take(params["word_emb"], input_ids, axis=0)              # (B, S, H) f32
    # Additive attention mask precomputed in f32 (no in-kernel int convert).
    neg_mask = ((1.0 - attention_mask.astype(jnp.float32)) * -1e9)[:, None, :]  # (B, 1, S)

    weight_keys = ("pos_emb", "type_emb", "glob_vecs", "wqkv", "bqkv", "wo",
                   "ln_vecs", "w1", "b1", "w2", "pool_w", "cls_w_pad", "cls_b_pad")
    weights = [params[k] for k in weight_keys]

    in_specs = [
        pl.BlockSpec((bt, S, HIDDEN), lambda g: (g, 0, 0)),   # per-block activations
        pl.BlockSpec((bt, 1, S), lambda g: (g, 0, 0)),        # per-block additive mask
    ] + [pl.BlockSpec(w.shape, _const_map(w.ndim)) for w in weights]  # resident weights
    # TODO(synk): for real BERT-base, replace the constant-index resident weights with
    # a layer grid axis / emit_pipeline weight streaming (won't fit v7x's 64 MiB VMEM).

    out = pl.pallas_call(
        _bert_fused_kernel,
        out_shape=jax.ShapeDtypeStruct((G, bt, CLS_PAD), jnp.float32),
        grid=(G,),
        in_specs=in_specs,
        out_specs=pl.BlockSpec((1, bt, CLS_PAD), lambda g: (g, 0, 0)),
        compiler_params=pltpu.CompilerParams(
            dimension_semantics=("parallel",)),
    )(word, neg_mask, *weights)

    return out.reshape(B, CLS_PAD)[:, :N_CLASSES]


if __name__ == "__main__":
    key = jax.random.PRNGKey(0)
    pkey, dkey = jax.random.split(key)
    params = init_params(pkey)

    B, S = 2, 8
    input_ids = jax.random.randint(dkey, (B, S), 0, VOCAB, dtype=jnp.int32)
    attention_mask = jnp.ones((B, S), dtype=jnp.int32).at[1, 6:].set(0)  # ragged batch

    fwd = jax.jit(bert_classifier_forward)
    logits = fwd(params, input_ids, attention_mask)
    logits = jax.block_until_ready(logits)
    assert logits.shape == (B, N_CLASSES)
    assert bool(jnp.all(jnp.isfinite(logits)))
    print("KERNEL_OK")
</pallas_src>

<mosaic_0001>
module attributes {stable_mosaic.version = 11 : i64} {
  func.func @_bert_fused_kernel(%arg0: i32, %arg1: memref<1x8x32xf32, #tpu.memory_space<vmem>>, %arg2: memref<1x1x8xf32, #tpu.memory_space<vmem>>, %arg3: memref<16x32xf32, #tpu.memory_space<vmem>>, %arg4: memref<2x32xf32, #tpu.memory_space<vmem>>, %arg5: memref<3x32xf32, #tpu.memory_space<vmem>>, %arg6: memref<2x32x96xbf16, #tpu.memory_space<vmem>>, %arg7: memref<2x1x96xf32, #tpu.memory_space<vmem>>, %arg8: memref<2x32x32xbf16, #tpu.memory_space<vmem>>, %arg9: memref<2x6x32xf32, #tpu.memory_space<vmem>>, %arg10: memref<2x32x64xbf16, #tpu.memory_space<vmem>>, %arg11: memref<2x1x64xf32, #tpu.memory_space<vmem>>, %arg12: memref<2x64x32xbf16, #tpu.memory_space<vmem>>, %arg13: memref<32x32xbf16, #tpu.memory_space<vmem>>, %arg14: memref<32x128xbf16, #tpu.memory_space<vmem>>, %arg15: memref<1x128xf32, #tpu.memory_space<vmem>>, %arg16: memref<1x1x128xf32, #tpu.memory_space<vmem>>) attributes {dimension_semantics = [#tpu.dimension_semantics<parallel>], iteration_bounds = array<i64: 2>, scalar_prefetch = 0 : i64, scratch_operands = 0 : i64, tpu.core_type = #tpu.core_type<tc>, window_params = [{transform_indices = @transform_0, window_bounds = array<i64: 1, 8, 32>}, {transform_indices = @transform_1, window_bounds = array<i64: 1, 1, 8>}, {pipeline_mode = #tpu.pipeline_mode<synchronous>, transform_indices = @transform_2, window_bounds = array<i64: 16, 32>}, {pipeline_mode = #tpu.pipeline_mode<synchronous>, transform_indices = @transform_3, window_bounds = array<i64: 2, 32>}, {pipeline_mode = #tpu.pipeline_mode<synchronous>, transform_indices = @transform_4, window_bounds = array<i64: 3, 32>}, {pipeline_mode = #tpu.pipeline_mode<synchronous>, transform_indices = @transform_5, window_bounds = array<i64: 2, 32, 96>}, {pipeline_mode = #tpu.pipeline_mode<synchronous>, transform_indices = @transform_6, window_bounds = array<i64: 2, 1, 96>}, {pipeline_mode = #tpu.pipeline_mode<synchronous>, transform_indices = @transform_7, window_bounds = array<i64: 2, 32, 32>}, {pipeline_mode = #tpu.pipeline_mode<synchronous>, transform_indices = @transform_8, window_bounds = array<i64: 2, 6, 32>}, {pipeline_mode = #tpu.pipeline_mode<synchronous>, transform_indices = @transform_9, window_bounds = array<i64: 2, 32, 64>}, {pipeline_mode = #tpu.pipeline_mode<synchronous>, transform_indices = @transform_10, window_bounds = array<i64: 2, 1, 64>}, {pipeline_mode = #tpu.pipeline_mode<synchronous>, transform_indices = @transform_11, window_bounds = array<i64: 2, 64, 32>}, {pipeline_mode = #tpu.pipeline_mode<synchronous>, transform_indices = @transform_12, window_bounds = array<i64: 32, 32>}, {pipeline_mode = #tpu.pipeline_mode<synchronous>, transform_indices = @transform_13, window_bounds = array<i64: 32, 128>}, {pipeline_mode = #tpu.pipeline_mode<synchronous>, transform_indices = @transform_14, window_bounds = array<i64: 1, 128>}, {transform_indices = @transform_15, window_bounds = array<i64: 1, 1, 128>}]} {
    %c0 = arith.constant 0 : index
    %c0_0 = arith.constant 0 : index
    %0 = vector.load %arg5[%c0, %c0_0] : memref<3x32xf32, #tpu.memory_space<vmem>>, vector<3x32xf32>
    %1 = vector.extract_strided_slice %0 {offsets = [0, 0], sizes = [1, 32], strides = [1, 1]} : vector<3x32xf32> to vector<1x32xf32>
    %2 = vector.extract_strided_slice %0 {offsets = [1, 0], sizes = [1, 32], strides = [1, 1]} : vector<3x32xf32> to vector<1x32xf32>
    %3 = vector.extract_strided_slice %0 {offsets = [2, 0], sizes = [1, 32], strides = [1, 1]} : vector<3x32xf32> to vector<1x32xf32>
    %c0_1 = arith.constant 0 : index
    %c0_2 = arith.constant 0 : index
    %c0_3 = arith.constant 0 : index
    %4 = vector.load %arg1[%c0_1, %c0_2, %c0_3] : memref<1x8x32xf32, #tpu.memory_space<vmem>>, vector<1x8x32xf32>
    %c0_4 = arith.constant 0 : index
    %c0_5 = arith.constant 0 : index
    %5 = vector.load %arg3[%c0_4, %c0_5] : memref<16x32xf32, #tpu.memory_space<vmem>>, vector<8x32xf32>
    %6 = vector.shape_cast %5 : vector<8x32xf32> to vector<1x8x32xf32>
    %7 = arith.addf %4, %6 : vector<1x8x32xf32>
    %c0_6 = arith.constant 0 : index
    %c0_7 = arith.constant 0 : index
    %8 = vector.load %arg4[%c0_6, %c0_7] : memref<2x32xf32, #tpu.memory_space<vmem>>, vector<1x32xf32>
    %9 = vector.shape_cast %8 : vector<1x32xf32> to vector<1x1x32xf32>
    %10 = vector.broadcast %9 : vector<1x1x32xf32> to vector<1x8x32xf32>
    %11 = arith.addf %7, %10 : vector<1x8x32xf32>
    %cst = arith.constant dense<0.000000e+00> : vector<1x8xf32>
    %12 = vector.multi_reduction <add>, %11, %cst [2] : vector<1x8x32xf32> to vector<1x8xf32>
    %13 = vector.shape_cast %12 : vector<1x8xf32> to vector<1x8x1xf32>
    %cst_8 = arith.constant 3.200000e+01 : f32
    %14 = vector.broadcast %cst_8 : f32 to vector<1x8x1xf32>
    %15 = arith.divf %13, %14 : vector<1x8x1xf32>
    %16 = arith.mulf %11, %11 : vector<1x8x32xf32>
    %cst_9 = arith.constant dense<0.000000e+00> : vector<1x8xf32>
    %17 = vector.multi_reduction <add>, %16, %cst_9 [2] : vector<1x8x32xf32> to vector<1x8xf32>
    %18 = vector.shape_cast %17 : vector<1x8xf32> to vector<1x8x1xf32>
    %cst_10 = arith.constant 3.200000e+01 : f32
    %19 = vector.broadcast %cst_10 : f32 to vector<1x8x1xf32>
    %20 = arith.divf %18, %19 : vector<1x8x1xf32>
    %21 = arith.mulf %15, %15 : vector<1x8x1xf32>
    %22 = arith.subf %20, %21 : vector<1x8x1xf32>
    %cst_11 = arith.constant 0.000000e+00 : f32
    %23 = vector.broadcast %cst_11 : f32 to vector<1x8x1xf32>
    %24 = arith.maximumf %22, %23 : vector<1x8x1xf32>
    %25 = vector.broadcast %15 : vector<1x8x1xf32> to vector<1x8x32xf32>
    %26 = arith.subf %11, %25 : vector<1x8x32xf32>
    %cst_12 = arith.constant 9.99999996E-13 : f32
    %27 = vector.broadcast %cst_12 : f32 to vector<1x8x1xf32>
    %28 = arith.addf %24, %27 : vector<1x8x1xf32>
    %29 = math.rsqrt %28 : vector<1x8x1xf32>
    %30 = vector.broadcast %29 : vector<1x8x1xf32> to vector<1x8x32xf32>
    %31 = arith.mulf %26, %30 : vector<1x8x32xf32>
    %32 = vector.shape_cast %1 : vector<1x32xf32> to vector<1x1x32xf32>
    %33 = vector.broadcast %32 : vector<1x1x32xf32> to vector<1x8x32xf32>
    %34 = arith.mulf %31, %33 : vector<1x8x32xf32>
    %35 = vector.shape_cast %2 : vector<1x32xf32> to vector<1x1x32xf32>
    %36 = vector.broadcast %35 : vector<1x1x32xf32> to vector<1x8x32xf32>
    %37 = arith.addf %34, %36 : vector<1x8x32xf32>
    %38 = vector.shape_cast %37 : vector<1x8x32xf32> to vector<8x32xf32>
    %c0_13 = arith.constant 0 : index
    %c0_14 = arith.constant 0 : index
    %c0_15 = arith.constant 0 : index
    %39 = vector.load %arg2[%c0_13, %c0_14, %c0_15] : memref<1x1x8xf32, #tpu.memory_space<vmem>>, vector<1x1x8xf32>
    %40 = tpu.concatenate %39, %39, %39, %39 in 0 : vector<1x1x8xf32>, vector<1x1x8xf32>, vector<1x1x8xf32>, vector<1x1x8xf32> -> vector<4x1x8xf32>
    %c0_16 = arith.constant 0 : index
    %c0_17 = arith.constant 0 : index
    %c0_18 = arith.constant 0 : index
    %41 = vector.load %arg9[%c0_16, %c0_17, %c0_18] : memref<2x6x32xf32, #tpu.memory_space<vmem>>, vector<1x6x32xf32>
    %42 = vector.shape_cast %41 : vector<1x6x32xf32> to vector<6x32xf32>
    %43 = vector.extract_strided_slice %42 {offsets = [0, 0], sizes = [1, 32], strides = [1, 1]} : vector<6x32xf32> to vector<1x32xf32>
    %44 = vector.extract_strided_slice %42 {offsets = [1, 0], sizes = [1, 32], strides = [1, 1]} : vector<6x32xf32> to vector<1x32xf32>
    %45 = vector.extract_strided_slice %42 {offsets = [2, 0], sizes = [1, 32], strides = [1, 1]} : vector<6x32xf32> to vector<1x32xf32>
    %46 = vector.extract_strided_slice %42 {offsets = [3, 0], sizes = [1, 32], strides = [1, 1]} : vector<6x32xf32> to vector<1x32xf32>
    %47 = vector.extract_strided_slice %42 {offsets = [4, 0], sizes = [1, 32], strides = [1, 1]} : vector<6x32xf32> to vector<1x32xf32>
    %48 = vector.extract_strided_slice %42 {offsets = [5, 0], sizes = [1, 32], strides = [1, 1]} : vector<6x32xf32> to vector<1x32xf32>
    %c0_19 = arith.constant 0 : index
    %c0_20 = arith.constant 0 : index
    %c0_21 = arith.constant 0 : index
    %49 = vector.load %arg6[%c0_19, %c0_20, %c0_21] : memref<2x32x96xbf16, #tpu.memory_space<vmem>>, vector<1x32x96xbf16>
    %50 = vector.shape_cast %49 : vector<1x32x96xbf16> to vector<32x96xbf16>
    %51 = arith.truncf %38 : vector<8x32xf32> to vector<8x32xbf16>
    %cst_22 = arith.constant dense<0.000000e+00> : vector<8x96xf32>
    %52 = tpu.matmul %51, %50, %cst_22 {dimension_numbers = #tpu.dot_dimension_numbers<[1], [0], [0], [1], [0, 0, 1, 1], [], []>} : vector<8x32xbf16>, vector<32x96xbf16>, vector<8x96xf32> -> vector<8x96xf32>
    %c0_23 = arith.constant 0 : index
    %c0_24 = arith.constant 0 : index
    %c0_25 = arith.constant 0 : index
    %53 = vector.load %arg7[%c0_23, %c0_24, %c0_25] : memref<2x1x96xf32, #tpu.memory_space<vmem>>, vector<1x1x96xf32>
    %54 = vector.shape_cast %53 : vector<1x1x96xf32> to vector<1x96xf32>
    %55 = vector.broadcast %54 : vector<1x96xf32> to vector<8x96xf32>
    %56 = arith.addf %52, %55 : vector<8x96xf32>
    %57 = vector.shape_cast %56 : vector<8x96xf32> to vector<1x8x96xf32>
    %58 = vector.extract_strided_slice %57 {offsets = [0, 0, 0], sizes = [1, 8, 8], strides = [1, 1, 1]} : vector<1x8x96xf32> to vector<1x8x8xf32>
    %59 = vector.extract_strided_slice %57 {offsets = [0, 0, 8], sizes = [1, 8, 8], strides = [1, 1, 1]} : vector<1x8x96xf32> to vector<1x8x8xf32>
    %60 = vector.extract_strided_slice %57 {offsets = [0, 0, 16], sizes = [1, 8, 8], strides = [1, 1, 1]} : vector<1x8x96xf32> to vector<1x8x8xf32>
    %61 = vector.extract_strided_slice %57 {offsets = [0, 0, 24], sizes = [1, 8, 8], strides = [1, 1, 1]} : vector<1x8x96xf32> to vector<1x8x8xf32>
    %62 = tpu.concatenate %58, %59, %60, %61 in 0 : vector<1x8x8xf32>, vector<1x8x8xf32>, vector<1x8x8xf32>, vector<1x8x8xf32> -> vector<4x8x8xf32>
    %63 = vector.extract_strided_slice %57 {offsets = [0, 0, 32], sizes = [1, 8, 8], strides = [1, 1, 1]} : vector<1x8x96xf32> to vector<1x8x8xf32>
    %64 = vector.extract_strided_slice %57 {offsets = [0, 0, 40], sizes = [1, 8, 8], strides = [1, 1, 1]} : vector<1x8x96xf32> to vector<1x8x8xf32>
    %65 = vector.extract_strided_slice %57 {offsets = [0, 0, 48], sizes = [1, 8, 8], strides = [1, 1, 1]} : vector<1x8x96xf32> to vector<1x8x8xf32>
    %66 = vector.extract_strided_slice %57 {offsets = [0, 0, 56], sizes = [1, 8, 8], strides = [1, 1, 1]} : vector<1x8x96xf32> to vector<1x8x8xf32>
    %67 = tpu.concatenate %63, %64, %65, %66 in 0 : vector<1x8x8xf32>, vector<1x8x8xf32>, vector<1x8x8xf32>, vector<1x8x8xf32> -> vector<4x8x8xf32>
    %68 = vector.extract_strided_slice %57 {offsets = [0, 0, 64], sizes = [1, 8, 8], strides = [1, 1, 1]} : vector<1x8x96xf32> to vector<1x8x8xf32>
    %69 = vector.extract_strided_slice %57 {offsets = [0, 0, 72], sizes = [1, 8, 8], strides = [1, 1, 1]} : vector<1x8x96xf32> to vector<1x8x8xf32>
    %70 = vector.extract_strided_slice %57 {offsets = [0, 0, 80], sizes = [1, 8, 8], strides = [1, 1, 1]} : vector<1x8x96xf32> to vector<1x8x8xf32>
    %71 = vector.extract_strided_slice %57 {offsets = [0, 0, 88], sizes = [1, 8, 8], strides = [1, 1, 1]} : vector<1x8x96xf32> to vector<1x8x8xf32>
    %72 = tpu.concatenate %68, %69, %70, %71 in 0 : vector<1x8x8xf32>, vector<1x8x8xf32>, vector<1x8x8xf32>, vector<1x8x8xf32> -> vector<4x8x8xf32>
    %73 = arith.truncf %62 : vector<4x8x8xf32> to vector<4x8x8xbf16>
    %74 = arith.truncf %67 : vector<4x8x8xf32> to vector<4x8x8xbf16>
    "tpu.trace_start"() <{level = 10 : i32, message = "bqd,bkd->bqk"}> : () -> ()
    %cst_26 = arith.constant dense<0.000000e+00> : vector<4x8x8xf32>
    %75 = tpu.matmul %73, %74, %cst_26 {dimension_numbers = #tpu.dot_dimension_numbers<[2], [2], [1], [1], [0, 0, 0, 1, 1, 1], [0], [0]>} : vector<4x8x8xbf16>, vector<4x8x8xbf16>, vector<4x8x8xf32> -> vector<4x8x8xf32>
    "tpu.trace_stop"() : () -> ()
    %76 = vector.broadcast %40 : vector<4x1x8xf32> to vector<4x8x8xf32>
    %77 = arith.addf %75, %76 : vector<4x8x8xf32>
    %cst_27 = arith.constant dense<0xFF800000> : vector<4x8xf32>
    %78 = vector.multi_reduction <maximumf>, %77, %cst_27 [2] : vector<4x8x8xf32> to vector<4x8xf32>
    %79 = vector.shape_cast %78 : vector<4x8xf32> to vector<4x8x1xf32>
    %80 = vector.broadcast %79 : vector<4x8x1xf32> to vector<4x8x8xf32>
    %81 = arith.subf %77, %80 : vector<4x8x8xf32>
    %82 = math.exp %81 : vector<4x8x8xf32>
    %cst_28 = arith.constant dense<0.000000e+00> : vector<4x8xf32>
    %83 = vector.multi_reduction <add>, %82, %cst_28 [2] : vector<4x8x8xf32> to vector<4x8xf32>
    %84 = vector.shape_cast %83 : vector<4x8xf32> to vector<4x8x1xf32>
    %85 = tpu.reciprocal %84 {approx = true} : vector<4x8x1xf32> -> vector<4x8x1xf32>
    %86 = vector.broadcast %85 : vector<4x8x1xf32> to vector<4x8x8xf32>
    %87 = arith.mulf %82, %86 : vector<4x8x8xf32>
    %88 = arith.truncf %87 : vector<4x8x8xf32> to vector<4x8x8xbf16>
    %89 = arith.truncf %72 : vector<4x8x8xf32> to vector<4x8x8xbf16>
    "tpu.trace_start"() <{level = 10 : i32, message = "bqk,bkd->bqd"}> : () -> ()
    %cst_29 = arith.constant dense<0.000000e+00> : vector<4x8x8xf32>
    %90 = tpu.matmul %88, %89, %cst_29 {dimension_numbers = #tpu.dot_dimension_numbers<[2], [1], [1], [2], [0, 0, 0, 1, 1, 2], [0], [0]>} : vector<4x8x8xbf16>, vector<4x8x8xbf16>, vector<4x8x8xf32> -> vector<4x8x8xf32>
    "tpu.trace_stop"() : () -> ()
    %c0_30 = arith.constant 0 : index
    %c0_31 = arith.constant 0 : index
    %c0_32 = arith.constant 0 : index
    %91 = vector.load %arg8[%c0_30, %c0_31, %c0_32] : memref<2x32x32xbf16, #tpu.memory_space<vmem>>, vector<1x32x32xbf16>
    %92 = vector.shape_cast %91 : vector<1x32x32xbf16> to vector<32x32xbf16>
    %93 = vector.extract_strided_slice %90 {offsets = [0, 0, 0], sizes = [1, 8, 8], strides = [1, 1, 1]} : vector<4x8x8xf32> to vector<1x8x8xf32>
    %94 = vector.shape_cast %93 : vector<1x8x8xf32> to vector<8x8xf32>
    %95 = vector.extract_strided_slice %92 {offsets = [0, 0], sizes = [8, 32], strides = [1, 1]} : vector<32x32xbf16> to vector<8x32xbf16>
    %96 = arith.truncf %94 : vector<8x8xf32> to vector<8x8xbf16>
    %cst_33 = arith.constant dense<0.000000e+00> : vector<8x32xf32>
    %97 = tpu.matmul %96, %95, %cst_33 {dimension_numbers = #tpu.dot_dimension_numbers<[1], [0], [0], [1], [0, 0, 1, 1], [], []>} : vector<8x8xbf16>, vector<8x32xbf16>, vector<8x32xf32> -> vector<8x32xf32>
    %98 = vector.extract_strided_slice %90 {offsets = [1, 0, 0], sizes = [1, 8, 8], strides = [1, 1, 1]} : vector<4x8x8xf32> to vector<1x8x8xf32>
    %99 = vector.shape_cast %98 : vector<1x8x8xf32> to vector<8x8xf32>
    %100 = vector.extract_strided_slice %92 {offsets = [8, 0], sizes = [8, 32], strides = [1, 1]} : vector<32x32xbf16> to vector<8x32xbf16>
    %101 = arith.truncf %99 : vector<8x8xf32> to vector<8x8xbf16>
    %cst_34 = arith.constant dense<0.000000e+00> : vector<8x32xf32>
    %102 = tpu.matmul %101, %100, %cst_34 {dimension_numbers = #tpu.dot_dimension_numbers<[1], [0], [0], [1], [0, 0, 1, 1], [], []>} : vector<8x8xbf16>, vector<8x32xbf16>, vector<8x32xf32> -> vector<8x32xf32>
    %103 = arith.addf %97, %102 : vector<8x32xf32>
    %104 = vector.extract_strided_slice %90 {offsets = [2, 0, 0], sizes = [1, 8, 8], strides = [1, 1, 1]} : vector<4x8x8xf32> to vector<1x8x8xf32>
    %105 = vector.shape_cast %104 : vector<1x8x8xf32> to vector<8x8xf32>
    %106 = vector.extract_strided_slice %92 {offsets = [16, 0], sizes = [8, 32], strides = [1, 1]} : vector<32x32xbf16> to vector<8x32xbf16>
    %107 = arith.truncf %105 : vector<8x8xf32> to vector<8x8xbf16>
    %cst_35 = arith.constant dense<0.000000e+00> : vector<8x32xf32>
    %108 = tpu.matmul %107, %106, %cst_35 {dimension_numbers = #tpu.dot_dimension_numbers<[1], [0], [0], [1], [0, 0, 1, 1], [], []>} : vector<8x8xbf16>, vector<8x32xbf16>, vector<8x32xf32> -> vector<8x32xf32>
    %109 = arith.addf %103, %108 : vector<8x32xf32>
    %110 = vector.extract_strided_slice %90 {offsets = [3, 0, 0], sizes = [1, 8, 8], strides = [1, 1, 1]} : vector<4x8x8xf32> to vector<1x8x8xf32>
    %111 = vector.shape_cast %110 : vector<1x8x8xf32> to vector<8x8xf32>
    %112 = vector.extract_strided_slice %92 {offsets = [24, 0], sizes = [8, 32], strides = [1, 1]} : vector<32x32xbf16> to vector<8x32xbf16>
    %113 = arith.truncf %111 : vector<8x8xf32> to vector<8x8xbf16>
    %cst_36 = arith.constant dense<0.000000e+00> : vector<8x32xf32>
    %114 = tpu.matmul %113, %112, %cst_36 {dimension_numbers = #tpu.dot_dimension_numbers<[1], [0], [0], [1], [0, 0, 1, 1], [], []>} : vector<8x8xbf16>, vector<8x32xbf16>, vector<8x32xf32> -> vector<8x32xf32>
    %115 = arith.addf %109, %114 : vector<8x32xf32>
    %116 = vector.broadcast %43 : vector<1x32xf32> to vector<8x32xf32>
    %117 = arith.addf %115, %116 : vector<8x32xf32>
    %118 = arith.addf %117, %38 : vector<8x32xf32>
    %cst_37 = arith.constant dense<0.000000e+00> : vector<8xf32>
    %119 = vector.multi_reduction <add>, %118, %cst_37 [1] : vector<8x32xf32> to vector<8xf32>
    %120 = vector.shape_cast %119 : vector<8xf32> to vector<8x1xf32>
    %cst_38 = arith.constant 3.200000e+01 : f32
    %121 = vector.broadcast %cst_38 : f32 to vector<8x1xf32>
    %122 = arith.divf %120, %121 : vector<8x1xf32>
    %123 = arith.mulf %118, %118 : vector<8x32xf32>
    %cst_39 = arith.constant dense<0.000000e+00> : vector<8xf32>
    %124 = vector.multi_reduction <add>, %123, %cst_39 [1] : vector<8x32xf32> to vector<8xf32>
    %125 = vector.shape_cast %124 : vector<8xf32> to vector<8x1xf32>
    %cst_40 = arith.constant 3.200000e+01 : f32
    %126 = vector.broadcast %cst_40 : f32 to vector<8x1xf32>
    %127 = arith.divf %125, %126 : vector<8x1xf32>
    %128 = arith.mulf %122, %122 : vector<8x1xf32>
    %129 = arith.subf %127, %128 : vector<8x1xf32>
    %cst_41 = arith.constant 0.000000e+00 : f32
    %130 = vector.broadcast %cst_41 : f32 to vector<8x1xf32>
    %131 = arith.maximumf %129, %130 : vector<8x1xf32>
    %132 = vector.broadcast %122 : vector<8x1xf32> to vector<8x32xf32>
    %133 = arith.subf %118, %132 : vector<8x32xf32>
    %cst_42 = arith.constant 9.99999996E-13 : f32
    %134 = vector.broadcast %cst_42 : f32 to vector<8x1xf32>
    %135 = arith.addf %131, %134 : vector<8x1xf32>
    %136 = math.rsqrt %135 : vector<8x1xf32>
    %137 = vector.broadcast %136 : vector<8x1xf32> to vector<8x32xf32>
    %138 = arith.mulf %133, %137 : vector<8x32xf32>
    %139 = vector.broadcast %44 : vector<1x32xf32> to vector<8x32xf32>
    %140 = arith.mulf %138, %139 : vector<8x32xf32>
    %141 = vector.broadcast %45 : vector<1x32xf32> to vector<8x32xf32>
    %142 = arith.addf %140, %141 : vector<8x32xf32>
    %c0_43 = arith.constant 0 : index
    %c0_44 = arith.constant 0 : index
    %c0_45 = arith.constant 0 : index
    %143 = vector.load %arg10[%c0_43, %c0_44, %c0_45] : memref<2x32x64xbf16, #tpu.memory_space<vmem>>, vector<1x32x64xbf16>
    %144 = vector.shape_cast %143 : vector<1x32x64xbf16> to vector<32x64xbf16>
    %145 = arith.truncf %142 : vector<8x32xf32> to vector<8x32xbf16>
    %cst_46 = arith.constant dense<0.000000e+00> : vector<8x64xf32>
    %146 = tpu.matmul %145, %144, %cst_46 {dimension_numbers = #tpu.dot_dimension_numbers<[1], [0], [0], [1], [0, 0, 1, 1], [], []>} : vector<8x32xbf16>, vector<32x64xbf16>, vector<8x64xf32> -> vector<8x64xf32>
    %c0_47 = arith.constant 0 : index
    %c0_48 = arith.constant 0 : index
    %c0_49 = arith.constant 0 : index
    %147 = vector.load %arg11[%c0_47, %c0_48, %c0_49] : memref<2x1x64xf32, #tpu.memory_space<vmem>>, vector<1x1x64xf32>
    %148 = vector.shape_cast %147 : vector<1x1x64xf32> to vector<1x64xf32>
    %149 = vector.broadcast %148 : vector<1x64xf32> to vector<8x64xf32>
    %150 = arith.addf %146, %149 : vector<8x64xf32>
    %151 = arith.mulf %150, %150 : vector<8x64xf32>
    %152 = arith.mulf %150, %151 : vector<8x64xf32>
    %cst_50 = arith.constant 4.471500e-02 : f32
    %153 = vector.broadcast %cst_50 : f32 to vector<8x64xf32>
    %154 = arith.mulf %153, %152 : vector<8x64xf32>
    %155 = arith.addf %150, %154 : vector<8x64xf32>
    %cst_51 = arith.constant 0.797884583 : f32
    %156 = vector.broadcast %cst_51 : f32 to vector<8x64xf32>
    %157 = arith.mulf %156, %155 : vector<8x64xf32>
    %158 = math.tanh %157 : vector<8x64xf32>
    %cst_52 = arith.constant 1.000000e+00 : f32
    %159 = vector.broadcast %cst_52 : f32 to vector<8x64xf32>
    %160 = arith.addf %159, %158 : vector<8x64xf32>
    %cst_53 = arith.constant 5.000000e-01 : f32
    %161 = vector.broadcast %cst_53 : f32 to vector<8x64xf32>
    %162 = arith.mulf %161, %160 : vector<8x64xf32>
    %163 = arith.mulf %150, %162 : vector<8x64xf32>
    %c0_54 = arith.constant 0 : index
    %c0_55 = arith.constant 0 : index
    %c0_56 = arith.constant 0 : index
    %164 = vector.load %arg12[%c0_54, %c0_55, %c0_56] : memref<2x64x32xbf16, #tpu.memory_space<vmem>>, vector<1x64x32xbf16>
    %165 = vector.shape_cast %164 : vector<1x64x32xbf16> to vector<64x32xbf16>
    %166 = arith.truncf %163 : vector<8x64xf32> to vector<8x64xbf16>
    %cst_57 = arith.constant dense<0.000000e+00> : vector<8x32xf32>
    %167 = tpu.matmul %166, %165, %cst_57 {dimension_numbers = #tpu.dot_dimension_numbers<[1], [0], [0], [1], [0, 0, 1, 1], [], []>} : vector<8x64xbf16>, vector<64x32xbf16>, vector<8x32xf32> -> vector<8x32xf32>
    %168 = vector.broadcast %46 : vector<1x32xf32> to vector<8x32xf32>
    %169 = arith.addf %167, %168 : vector<8x32xf32>
    %170 = arith.addf %169, %142 : vector<8x32xf32>
    %cst_58 = arith.constant dense<0.000000e+00> : vector<8xf32>
    %171 = vector.multi_reduction <add>, %170, %cst_58 [1] : vector<8x32xf32> to vector<8xf32>
    %172 = vector.shape_cast %171 : vector<8xf32> to vector<8x1xf32>
    %cst_59 = arith.constant 3.200000e+01 : f32
    %173 = vector.broadcast %cst_59 : f32 to vector<8x1xf32>
    %174 = arith.divf %172, %173 : vector<8x1xf32>
    %175 = arith.mulf %170, %170 : vector<8x32xf32>
    %cst_60 = arith.constant dense<0.000000e+00> : vector<8xf32>
    %176 = vector.multi_reduction <add>, %175, %cst_60 [1] : vector<8x32xf32> to vector<8xf32>
    %177 = vector.shape_cast %176 : vector<8xf32> to vector<8x1xf32>
    %cst_61 = arith.constant 3.200000e+01 : f32
    %178 = vector.broadcast %cst_61 : f32 to vector<8x1xf32>
    %179 = arith.divf %177, %178 : vector<8x1xf32>
    %180 = arith.mulf %174, %174 : vector<8x1xf32>
    %181 = arith.subf %179, %180 : vector<8x1xf32>
    %cst_62 = arith.constant 0.000000e+00 : f32
    %182 = vector.broadcast %cst_62 : f32 to vector<8x1xf32>
    %183 = arith.maximumf %181, %182 : vector<8x1xf32>
    %184 = vector.broadcast %174 : vector<8x1xf32> to vector<8x32xf32>
    %185 = arith.subf %170, %184 : vector<8x32xf32>
    %cst_63 = arith.constant 9.99999996E-13 : f32
    %186 = vector.broadcast %cst_63 : f32 to vector<8x1xf32>
    %187 = arith.addf %183, %186 : vector<8x1xf32>
    %188 = math.rsqrt %187 : vector<8x1xf32>
    %189 = vector.broadcast %188 : vector<8x1xf32> to vector<8x32xf32>
    %190 = arith.mulf %185, %189 : vector<8x32xf32>
    %191 = vector.broadcast %47 : vector<1x32xf32> to vector<8x32xf32>
    %192 = arith.mulf %190, %191 : vector<8x32xf32>
    %193 = vector.broadcast %48 : vector<1x32xf32> to vector<8x32xf32>
    %194 = arith.addf %192, %193 : vector<8x32xf32>
    %c1 = arith.constant 1 : index
    %c0_64 = arith.constant 0 : index
    %c0_65 = arith.constant 0 : index
    %195 = vector.load %arg9[%c1, %c0_64, %c0_65] : memref<2x6x32xf32, #tpu.memory_space<vmem>>, vector<1x6x32xf32>
    %196 = vector.shape_cast %195 : vector<1x6x32xf32> to vector<6x32xf32>
    %197 = vector.extract_strided_slice %196 {offsets = [0, 0], sizes = [1, 32], strides = [1, 1]} : vector<6x32xf32> to vector<1x32xf32>
    %198 = vector.extract_strided_slice %196 {offsets = [1, 0], sizes = [1, 32], strides = [1, 1]} : vector<6x32xf32> to vector<1x32xf32>
    %199 = vector.extract_strided_slice %196 {offsets = [2, 0], sizes = [1, 32], strides = [1, 1]} : vector<6x32xf32> to vector<1x32xf32>
    %200 = vector.extract_strided_slice %196 {offsets = [3, 0], sizes = [1, 32], strides = [1, 1]} : vector<6x32xf32> to vector<1x32xf32>
    %201 = vector.extract_strided_slice %196 {offsets = [4, 0], sizes = [1, 32], strides = [1, 1]} : vector<6x32xf32> to vector<1x32xf32>
    %202 = vector.extract_strided_slice %196 {offsets = [5, 0], sizes = [1, 32], strides = [1, 1]} : vector<6x32xf32> to vector<1x32xf32>
    %c1_66 = arith.constant 1 : index
    %c0_67 = arith.constant 0 : index
    %c0_68 = arith.constant 0 : index
    %203 = vector.load %arg6[%c1_66, %c0_67, %c0_68] : memref<2x32x96xbf16, #tpu.memory_space<vmem>>, vector<1x32x96xbf16>
    %204 = vector.shape_cast %203 : vector<1x32x96xbf16> to vector<32x96xbf16>
    %205 = arith.truncf %194 : vector<8x32xf32> to vector<8x32xbf16>
    %cst_69 = arith.constant dense<0.000000e+00> : vector<8x96xf32>
    %206 = tpu.matmul %205, %204, %cst_69 {dimension_numbers = #tpu.dot_dimension_numbers<[1], [0], [0], [1], [0, 0, 1, 1], [], []>} : vector<8x32xbf16>, vector<32x96xbf16>, vector<8x96xf32> -> vector<8x96xf32>
    %c1_70 = arith.constant 1 : index
    %c0_71 = arith.constant 0 : index
    %c0_72 = arith.constant 0 : index
    %207 = vector.load %arg7[%c1_70, %c0_71, %c0_72] : memref<2x1x96xf32, #tpu.memory_space<vmem>>, vector<1x1x96xf32>
    %208 = vector.shape_cast %207 : vector<1x1x96xf32> to vector<1x96xf32>
    %209 = vector.broadcast %208 : vector<1x96xf32> to vector<8x96xf32>
    %210 = arith.addf %206, %209 : vector<8x96xf32>
    %211 = vector.shape_cast %210 : vector<8x96xf32> to vector<1x8x96xf32>
    %212 = vector.extract_strided_slice %211 {offsets = [0, 0, 0], sizes = [1, 8, 8], strides = [1, 1, 1]} : vector<1x8x96xf32> to vector<1x8x8xf32>
    %213 = vector.extract_strided_slice %211 {offsets = [0, 0, 8], sizes = [1, 8, 8], strides = [1, 1, 1]} : vector<1x8x96xf32> to vector<1x8x8xf32>
    %214 = vector.extract_strided_slice %211 {offsets = [0, 0, 16], sizes = [1, 8, 8], strides = [1, 1, 1]} : vector<1x8x96xf32> to vector<1x8x8xf32>
    %215 = vector.extract_strided_slice %211 {offsets = [0, 0, 24], sizes = [1, 8, 8], strides = [1, 1, 1]} : vector<1x8x96xf32> to vector<1x8x8xf32>
    %216 = tpu.concatenate %212, %213, %214, %215 in 0 : vector<1x8x8xf32>, vector<1x8x8xf32>, vector<1x8x8xf32>, vector<1x8x8xf32> -> vector<4x8x8xf32>
    %217 = vector.extract_strided_slice %211 {offsets = [0, 0, 32], sizes = [1, 8, 8], strides = [1, 1, 1]} : vector<1x8x96xf32> to vector<1x8x8xf32>
    %218 = vector.extract_strided_slice %211 {offsets = [0, 0, 40], sizes = [1, 8, 8], strides = [1, 1, 1]} : vector<1x8x96xf32> to vector<1x8x8xf32>
    %219 = vector.extract_strided_slice %211 {offsets = [0, 0, 48], sizes = [1, 8, 8], strides = [1, 1, 1]} : vector<1x8x96xf32> to vector<1x8x8xf32>
    %220 = vector.extract_strided_slice %211 {offsets = [0, 0, 56], sizes = [1, 8, 8], strides = [1, 1, 1]} : vector<1x8x96xf32> to vector<1x8x8xf32>
    %221 = tpu.concatenate %217, %218, %219, %220 in 0 : vector<1x8x8xf32>, vector<1x8x8xf32>, vector<1x8x8xf32>, vector<1x8x8xf32> -> vector<4x8x8xf32>
    %222 = vector.extract_strided_slice %211 {offsets = [0, 0, 64], sizes = [1, 8, 8], strides = [1, 1, 1]} : vector<1x8x96xf32> to vector<1x8x8xf32>
    %223 = vector.extract_strided_slice %211 {offsets = [0, 0, 72], sizes = [1, 8, 8], strides = [1, 1, 1]} : vector<1x8x96xf32> to vector<1x8x8xf32>
    %224 = vector.extract_strided_slice %211 {offsets = [0, 0, 80], sizes = [1, 8, 8], strides = [1, 1, 1]} : vector<1x8x96xf32> to vector<1x8x8xf32>
    %225 = vector.extract_strided_slice %211 {offsets = [0, 0, 88], sizes = [1, 8, 8], strides = [1, 1, 1]} : vector<1x8x96xf32> to vector<1x8x8xf32>
    %226 = tpu.concatenate %222, %223, %224, %225 in 0 : vector<1x8x8xf32>, vector<1x8x8xf32>, vector<1x8x8xf32>, vector<1x8x8xf32> -> vector<4x8x8xf32>
    %227 = arith.truncf %216 : vector<4x8x8xf32> to vector<4x8x8xbf16>
    %228 = arith.truncf %221 : vector<4x8x8xf32> to vector<4x8x8xbf16>
    "tpu.trace_start"() <{level = 10 : i32, message = "bqd,bkd->bqk"}> : () -> ()
    %cst_73 = arith.constant dense<0.000000e+00> : vector<4x8x8xf32>
    %229 = tpu.matmul %227, %228, %cst_73 {dimension_numbers = #tpu.dot_dimension_numbers<[2], [2], [1], [1], [0, 0, 0, 1, 1, 1], [0], [0]>} : vector<4x8x8xbf16>, vector<4x8x8xbf16>, vector<4x8x8xf32> -> vector<4x8x8xf32>
    "tpu.trace_stop"() : () -> ()
    %230 = vector.broadcast %40 : vector<4x1x8xf32> to vector<4x8x8xf32>
    %231 = arith.addf %229, %230 : vector<4x8x8xf32>
    %cst_74 = arith.constant dense<0xFF800000> : vector<4x8xf32>
    %232 = vector.multi_reduction <maximumf>, %231, %cst_74 [2] : vector<4x8x8xf32> to vector<4x8xf32>
    %233 = vector.shape_cast %232 : vector<4x8xf32> to vector<4x8x1xf32>
    %234 = vector.broadcast %233 : vector<4x8x1xf32> to vector<4x8x8xf32>
    %235 = arith.subf %231, %234 : vector<4x8x8xf32>
    %236 = math.exp %235 : vector<4x8x8xf32>
    %cst_75 = arith.constant dense<0.000000e+00> : vector<4x8xf32>
    %237 = vector.multi_reduction <add>, %236, %cst_75 [2] : vector<4x8x8xf32> to vector<4x8xf32>
    %238 = vector.shape_cast %237 : vector<4x8xf32> to vector<4x8x1xf32>
    %239 = tpu.reciprocal %238 {approx = true} : vector<4x8x1xf32> -> vector<4x8x1xf32>
    %240 = vector.broadcast %239 : vector<4x8x1xf32> to vector<4x8x8xf32>
    %241 = arith.mulf %236, %240 : vector<4x8x8xf32>
    %242 = arith.truncf %241 : vector<4x8x8xf32> to vector<4x8x8xbf16>
    %243 = arith.truncf %226 : vector<4x8x8xf32> to vector<4x8x8xbf16>
    "tpu.trace_start"() <{level = 10 : i32, message = "bqk,bkd->bqd"}> : () -> ()
    %cst_76 = arith.constant dense<0.000000e+00> : vector<4x8x8xf32>
    %244 = tpu.matmul %242, %243, %cst_76 {dimension_numbers = #tpu.dot_dimension_numbers<[2], [1], [1], [2], [0, 0, 0, 1, 1, 2], [0], [0]>} : vector<4x8x8xbf16>, vector<4x8x8xbf16>, vector<4x8x8xf32> -> vector<4x8x8xf32>
    "tpu.trace_stop"() : () -> ()
    %c1_77 = arith.constant 1 : index
    %c0_78 = arith.constant 0 : index
    %c0_79 = arith.constant 0 : index
    %245 = vector.load %arg8[%c1_77, %c0_78, %c0_79] : memref<2x32x32xbf16, #tpu.memory_space<vmem>>, vector<1x32x32xbf16>
    %246 = vector.shape_cast %245 : vector<1x32x32xbf16> to vector<32x32xbf16>
    %247 = vector.extract_strided_slice %244 {offsets = [0, 0, 0], sizes = [1, 8, 8], strides = [1, 1, 1]} : vector<4x8x8xf32> to vector<1x8x8xf32>
    %248 = vector.shape_cast %247 : vector<1x8x8xf32> to vector<8x8xf32>
    %249 = vector.extract_strided_slice %246 {offsets = [0, 0], sizes = [8, 32], strides = [1, 1]} : vector<32x32xbf16> to vector<8x32xbf16>
    %250 = arith.truncf %248 : vector<8x8xf32> to vector<8x8xbf16>
    %cst_80 = arith.constant dense<0.000000e+00> : vector<8x32xf32>
    %251 = tpu.matmul %250, %249, %cst_80 {dimension_numbers = #tpu.dot_dimension_numbers<[1], [0], [0], [1], [0, 0, 1, 1], [], []>} : vector<8x8xbf16>, vector<8x32xbf16>, vector<8x32xf32> -> vector<8x32xf32>
    %252 = vector.extract_strided_slice %244 {offsets = [1, 0, 0], sizes = [1, 8, 8], strides = [1, 1, 1]} : vector<4x8x8xf32> to vector<1x8x8xf32>
    %253 = vector.shape_cast %252 : vector<1x8x8xf32> to vector<8x8xf32>
    %254 = vector.extract_strided_slice %246 {offsets = [8, 0], sizes = [8, 32], strides = [1, 1]} : vector<32x32xbf16> to vector<8x32xbf16>
    %255 = arith.truncf %253 : vector<8x8xf32> to vector<8x8xbf16>
    %cst_81 = arith.constant dense<0.000000e+00> : vector<8x32xf32>
    %256 = tpu.matmul %255, %254, %cst_81 {dimension_numbers = #tpu.dot_dimension_numbers<[1], [0], [0], [1], [0, 0, 1, 1], [], []>} : vector<8x8xbf16>, vector<8x32xbf16>, vector<8x32xf32> -> vector<8x32xf32>
    %257 = arith.addf %251, %256 : vector<8x32xf32>
    %258 = vector.extract_strided_slice %244 {offsets = [2, 0, 0], sizes = [1, 8, 8], strides = [1, 1, 1]} : vector<4x8x8xf32> to vector<1x8x8xf32>
    %259 = vector.shape_cast %258 : vector<1x8x8xf32> to vector<8x8xf32>
    %260 = vector.extract_strided_slice %246 {offsets = [16, 0], sizes = [8, 32], strides = [1, 1]} : vector<32x32xbf16> to vector<8x32xbf16>
    %261 = arith.truncf %259 : vector<8x8xf32> to vector<8x8xbf16>
    %cst_82 = arith.constant dense<0.000000e+00> : vector<8x32xf32>
    %262 = tpu.matmul %261, %260, %cst_82 {dimension_numbers = #tpu.dot_dimension_numbers<[1], [0], [0], [1], [0, 0, 1, 1], [], []>} : vector<8x8xbf16>, vector<8x32xbf16>, vector<8x32xf32> -> vector<8x32xf32>
    %263 = arith.addf %257, %262 : vector<8x32xf32>
    %264 = vector.extract_strided_slice %244 {offsets = [3, 0, 0], sizes = [1, 8, 8], strides = [1, 1, 1]} : vector<4x8x8xf32> to vector<1x8x8xf32>
    %265 = vector.shape_cast %264 : vector<1x8x8xf32> to vector<8x8xf32>
    %266 = vector.extract_strided_slice %246 {offsets = [24, 0], sizes = [8, 32], strides = [1, 1]} : vector<32x32xbf16> to vector<8x32xbf16>
    %267 = arith.truncf %265 : vector<8x8xf32> to vector<8x8xbf16>
    %cst_83 = arith.constant dense<0.000000e+00> : vector<8x32xf32>
    %268 = tpu.matmul %267, %266, %cst_83 {dimension_numbers = #tpu.dot_dimension_numbers<[1], [0], [0], [1], [0, 0, 1, 1], [], []>} : vector<8x8xbf16>, vector<8x32xbf16>, vector<8x32xf32> -> vector<8x32xf32>
    %269 = arith.addf %263, %268 : vector<8x32xf32>
    %270 = vector.broadcast %197 : vector<1x32xf32> to vector<8x32xf32>
    %271 = arith.addf %269, %270 : vector<8x32xf32>
    %272 = arith.addf %271, %194 : vector<8x32xf32>
    %cst_84 = arith.constant dense<0.000000e+00> : vector<8xf32>
    %273 = vector.multi_reduction <add>, %272, %cst_84 [1] : vector<8x32xf32> to vector<8xf32>
    %274 = vector.shape_cast %273 : vector<8xf32> to vector<8x1xf32>
    %cst_85 = arith.constant 3.200000e+01 : f32
    %275 = vector.broadcast %cst_85 : f32 to vector<8x1xf32>
    %276 = arith.divf %274, %275 : vector<8x1xf32>
    %277 = arith.mulf %272, %272 : vector<8x32xf32>
    %cst_86 = arith.constant dense<0.000000e+00> : vector<8xf32>
    %278 = vector.multi_reduction <add>, %277, %cst_86 [1] : vector<8x32xf32> to vector<8xf32>
    %279 = vector.shape_cast %278 : vector<8xf32> to vector<8x1xf32>
    %cst_87 = arith.constant 3.200000e+01 : f32
    %280 = vector.broadcast %cst_87 : f32 to vector<8x1xf32>
    %281 = arith.divf %279, %280 : vector<8x1xf32>
    %282 = arith.mulf %276, %276 : vector<8x1xf32>
    %283 = arith.subf %281, %282 : vector<8x1xf32>
    %cst_88 = arith.constant 0.000000e+00 : f32
    %284 = vector.broadcast %cst_88 : f32 to vector<8x1xf32>
    %285 = arith.maximumf %283, %284 : vector<8x1xf32>
    %286 = vector.broadcast %276 : vector<8x1xf32> to vector<8x32xf32>
    %287 = arith.subf %272, %286 : vector<8x32xf32>
    %cst_89 = arith.constant 9.99999996E-13 : f32
    %288 = vector.broadcast %cst_89 : f32 to vector<8x1xf32>
    %289 = arith.addf %285, %288 : vector<8x1xf32>
    %290 = math.rsqrt %289 : vector<8x1xf32>
    %291 = vector.broadcast %290 : vector<8x1xf32> to vector<8x32xf32>
    %292 = arith.mulf %287, %291 : vector<8x32xf32>
    %293 = vector.broadcast %198 : vector<1x32xf32> to vector<8x32xf32>
    %294 = arith.mulf %292, %293 : vector<8x32xf32>
    %295 = vector.broadcast %199 : vector<1x32xf32> to vector<8x32xf32>
    %296 = arith.addf %294, %295 : vector<8x32xf32>
    %c1_90 = arith.constant 1 : index
    %c0_91 = arith.constant 0 : index
    %c0_92 = arith.constant 0 : index
    %297 = vector.load %arg10[%c1_90, %c0_91, %c0_92] : memref<2x32x64xbf16, #tpu.memory_space<vmem>>, vector<1x32x64xbf16>
    %298 = vector.shape_cast %297 : vector<1x32x64xbf16> to vector<32x64xbf16>
    %299 = arith.truncf %296 : vector<8x32xf32> to vector<8x32xbf16>
    %cst_93 = arith.constant dense<0.000000e+00> : vector<8x64xf32>
    %300 = tpu.matmul %299, %298, %cst_93 {dimension_numbers = #tpu.dot_dimension_numbers<[1], [0], [0], [1], [0, 0, 1, 1], [], []>} : vector<8x32xbf16>, vector<32x64xbf16>, vector<8x64xf32> -> vector<8x64xf32>
    %c1_94 = arith.constant 1 : index
    %c0_95 = arith.constant 0 : index
    %c0_96 = arith.constant 0 : index
    %301 = vector.load %arg11[%c1_94, %c0_95, %c0_96] : memref<2x1x64xf32, #tpu.memory_space<vmem>>, vector<1x1x64xf32>
    %302 = vector.shape_cast %301 : vector<1x1x64xf32> to vector<1x64xf32>
    %303 = vector.broadcast %302 : vector<1x64xf32> to vector<8x64xf32>
    %304 = arith.addf %300, %303 : vector<8x64xf32>
    %305 = arith.mulf %304, %304 : vector<8x64xf32>
    %306 = arith.mulf %304, %305 : vector<8x64xf32>
    %cst_97 = arith.constant 4.471500e-02 : f32
    %307 = vector.broadcast %cst_97 : f32 to vector<8x64xf32>
    %308 = arith.mulf %307, %306 : vector<8x64xf32>
    %309 = arith.addf %304, %308 : vector<8x64xf32>
    %cst_98 = arith.constant 0.797884583 : f32
    %310 = vector.broadcast %cst_98 : f32 to vector<8x64xf32>
    %311 = arith.mulf %310, %309 : vector<8x64xf32>
    %312 = math.tanh %311 : vector<8x64xf32>
    %cst_99 = arith.constant 1.000000e+00 : f32
    %313 = vector.broadcast %cst_99 : f32 to vector<8x64xf32>
    %314 = arith.addf %313, %312 : vector<8x64xf32>
    %cst_100 = arith.constant 5.000000e-01 : f32
    %315 = vector.broadcast %cst_100 : f32 to vector<8x64xf32>
    %316 = arith.mulf %315, %314 : vector<8x64xf32>
    %317 = arith.mulf %304, %316 : vector<8x64xf32>
    %c1_101 = arith.constant 1 : index
    %c0_102 = arith.constant 0 : index
    %c0_103 = arith.constant 0 : index
    %318 = vector.load %arg12[%c1_101, %c0_102, %c0_103] : memref<2x64x32xbf16, #tpu.memory_space<vmem>>, vector<1x64x32xbf16>
    %319 = vector.shape_cast %318 : vector<1x64x32xbf16> to vector<64x32xbf16>
    %320 = arith.truncf %317 : vector<8x64xf32> to vector<8x64xbf16>
    %cst_104 = arith.constant dense<0.000000e+00> : vector<8x32xf32>
    %321 = tpu.matmul %320, %319, %cst_104 {dimension_numbers = #tpu.dot_dimension_numbers<[1], [0], [0], [1], [0, 0, 1, 1], [], []>} : vector<8x64xbf16>, vector<64x32xbf16>, vector<8x32xf32> -> vector<8x32xf32>
    %322 = vector.broadcast %200 : vector<1x32xf32> to vector<8x32xf32>
    %323 = arith.addf %321, %322 : vector<8x32xf32>
    %324 = arith.addf %323, %296 : vector<8x32xf32>
    %cst_105 = arith.constant dense<0.000000e+00> : vector<8xf32>
    %325 = vector.multi_reduction <add>, %324, %cst_105 [1] : vector<8x32xf32> to vector<8xf32>
    %326 = vector.shape_cast %325 : vector<8xf32> to vector<8x1xf32>
    %cst_106 = arith.constant 3.200000e+01 : f32
    %327 = vector.broadcast %cst_106 : f32 to vector<8x1xf32>
    %328 = arith.divf %326, %327 : vector<8x1xf32>
    %329 = arith.mulf %324, %324 : vector<8x32xf32>
    %cst_107 = arith.constant dense<0.000000e+00> : vector<8xf32>
    %330 = vector.multi_reduction <add>, %329, %cst_107 [1] : vector<8x32xf32> to vector<8xf32>
    %331 = vector.shape_cast %330 : vector<8xf32> to vector<8x1xf32>
    %cst_108 = arith.constant 3.200000e+01 : f32
    %332 = vector.broadcast %cst_108 : f32 to vector<8x1xf32>
    %333 = arith.divf %331, %332 : vector<8x1xf32>
    %334 = arith.mulf %328, %328 : vector<8x1xf32>
    %335 = arith.subf %333, %334 : vector<8x1xf32>
    %cst_109 = arith.constant 0.000000e+00 : f32
    %336 = vector.broadcast %cst_109 : f32 to vector<8x1xf32>
    %337 = arith.maximumf %335, %336 : vector<8x1xf32>
    %338 = vector.broadcast %328 : vector<8x1xf32> to vector<8x32xf32>
    %339 = arith.subf %324, %338 : vector<8x32xf32>
    %cst_110 = arith.constant 9.99999996E-13 : f32
    %340 = vector.broadcast %cst_110 : f32 to vector<8x1xf32>
    %341 = arith.addf %337, %340 : vector<8x1xf32>
    %342 = math.rsqrt %341 : vector<8x1xf32>
    %343 = vector.broadcast %342 : vector<8x1xf32> to vector<8x32xf32>
    %344 = arith.mulf %339, %343 : vector<8x32xf32>
    %345 = vector.broadcast %201 : vector<1x32xf32> to vector<8x32xf32>
    %346 = arith.mulf %344, %345 : vector<8x32xf32>
    %347 = vector.broadcast %202 : vector<1x32xf32> to vector<8x32xf32>
    %348 = arith.addf %346, %347 : vector<8x32xf32>
    %349 = vector.shape_cast %348 : vector<8x32xf32> to vector<1x8x32xf32>
    %350 = vector.extract_strided_slice %349 {offsets = [0, 0, 0], sizes = [1, 1, 32], strides = [1, 1, 1]} : vector<1x8x32xf32> to vector<1x1x32xf32>
    %351 = vector.shape_cast %350 : vector<1x1x32xf32> to vector<1x32xf32>
    %c0_111 = arith.constant 0 : index
    %c0_112 = arith.constant 0 : index
    %352 = vector.load %arg13[%c0_111, %c0_112] : memref<32x32xbf16, #tpu.memory_space<vmem>>, vector<32x32xbf16>
    %353 = arith.truncf %351 : vector<1x32xf32> to vector<1x32xbf16>
    %cst_113 = arith.constant dense<0.000000e+00> : vector<1x32xf32>
    %354 = tpu.matmul %353, %352, %cst_113 {dimension_numbers = #tpu.dot_dimension_numbers<[1], [0], [0], [1], [0, 0, 1, 1], [], []>} : vector<1x32xbf16>, vector<32x32xbf16>, vector<1x32xf32> -> vector<1x32xf32>
    %355 = arith.addf %354, %3 : vector<1x32xf32>
    %356 = math.tanh %355 : vector<1x32xf32>
    %c0_114 = arith.constant 0 : index
    %c0_115 = arith.constant 0 : index
    %357 = vector.load %arg14[%c0_114, %c0_115] : memref<32x128xbf16, #tpu.memory_space<vmem>>, vector<32x128xbf16>
    %358 = arith.truncf %356 : vector<1x32xf32> to vector<1x32xbf16>
    %cst_116 = arith.constant dense<0.000000e+00> : vector<1x128xf32>
    %359 = tpu.matmul %358, %357, %cst_116 {dimension_numbers = #tpu.dot_dimension_numbers<[1], [0], [0], [1], [0, 0, 1, 1], [], []>} : vector<1x32xbf16>, vector<32x128xbf16>, vector<1x128xf32> -> vector<1x128xf32>
    %c0_117 = arith.constant 0 : index
    %c0_118 = arith.constant 0 : index
    %360 = vector.load %arg15[%c0_117, %c0_118] : memref<1x128xf32, #tpu.memory_space<vmem>>, vector<1x128xf32>
    %361 = arith.addf %359, %360 : vector<1x128xf32>
    %c0_119 = arith.constant 0 : index
    %c0_120 = arith.constant 0 : index
    %c0_121 = arith.constant 0 : index
    %362 = vector.load %arg16[%c0_119, %c0_120, %c0_121] : memref<1x1x128xf32, #tpu.memory_space<vmem>>, vector<1x1x128xf32>
    %363 = vector.shape_cast %362 : vector<1x1x128xf32> to vector<1x128xf32>
    %364 = vector.shape_cast %361 : vector<1x128xf32> to vector<1x1x128xf32>
    tpu.vector_store %arg16[%c0_119, %c0_120, %c0_121], %364 {strides = array<i32>} : memref<1x1x128xf32, #tpu.memory_space<vmem>>, vector<1x1x128xf32>,
    return
  }
  func.func @transform_0(%arg0: i32) -> (i32, i32, i32) {
    %c0_i32 = arith.constant 0 : i32
    %c0_i32_0 = arith.constant 0 : i32
    %c0_i32_1 = arith.constant 0 : i32
    return %arg0, %c0_i32, %c0_i32_0 : i32, i32, i32
  }
  func.func @transform_1(%arg0: i32) -> (i32, i32, i32) {
    %c0_i32 = arith.constant 0 : i32
    %c0_i32_0 = arith.constant 0 : i32
    %c0_i32_1 = arith.constant 0 : i32
    return %arg0, %c0_i32, %c0_i32_0 : i32, i32, i32
  }
  func.func @transform_2(%arg0: i32) -> (i32, i32) {
    %c0_i32 = arith.constant 0 : i32
    %c0_i32_0 = arith.constant 0 : i32
    %c0_i32_1 = arith.constant 0 : i32
    return %c0_i32, %c0_i32_0 : i32, i32
  }
  func.func @transform_3(%arg0: i32) -> (i32, i32) {
    %c0_i32 = arith.constant 0 : i32
    %c0_i32_0 = arith.constant 0 : i32
    %c0_i32_1 = arith.constant 0 : i32
    return %c0_i32, %c0_i32_0 : i32, i32
  }
  func.func @transform_4(%arg0: i32) -> (i32, i32) {
    %c0_i32 = arith.constant 0 : i32
    %c0_i32_0 = arith.constant 0 : i32
    %c0_i32_1 = arith.constant 0 : i32
    return %c0_i32, %c0_i32_0 : i32, i32
  }
  func.func @transform_5(%arg0: i32) -> (i32, i32, i32) {
    %c0_i32 = arith.constant 0 : i32
    %c0_i32_0 = arith.constant 0 : i32
    %c0_i32_1 = arith.constant 0 : i32
    %c0_i32_2 = arith.constant 0 : i32
    return %c0_i32, %c0_i32_0, %c0_i32_1 : i32, i32, i32
  }
  func.func @transform_6(%arg0: i32) -> (i32, i32, i32) {
    %c0_i32 = arith.constant 0 : i32
    %c0_i32_0 = arith.constant 0 : i32
    %c0_i32_1 = arith.constant 0 : i32
    %c0_i32_2 = arith.constant 0 : i32
    return %c0_i32, %c0_i32_0, %c0_i32_1 : i32, i32, i32
  }
  func.func @transform_7(%arg0: i32) -> (i32, i32, i32) {
    %c0_i32 = arith.constant 0 : i32
    %c0_i32_0 = arith.constant 0 : i32
    %c0_i32_1 = arith.constant 0 : i32
    %c0_i32_2 = arith.constant 0 : i32
    return %c0_i32, %c0_i32_0, %c0_i32_1 : i32, i32, i32
  }
  func.func @transform_8(%arg0: i32) -> (i32, i32, i32) {
    %c0_i32 = arith.constant 0 : i32
    %c0_i32_0 = arith.constant 0 : i32
    %c0_i32_1 = arith.constant 0 : i32
    %c0_i32_2 = arith.constant 0 : i32
    return %c0_i32, %c0_i32_0, %c0_i32_1 : i32, i32, i32
  }
  func.func @transform_9(%arg0: i32) -> (i32, i32, i32) {
    %c0_i32 = arith.constant 0 : i32
    %c0_i32_0 = arith.constant 0 : i32
    %c0_i32_1 = arith.constant 0 : i32
    %c0_i32_2 = arith.constant 0 : i32
    return %c0_i32, %c0_i32_0, %c0_i32_1 : i32, i32, i32
  }
  func.func @transform_10(%arg0: i32) -> (i32, i32, i32) {
    %c0_i32 = arith.constant 0 : i32
    %c0_i32_0 = arith.constant 0 : i32
    %c0_i32_1 = arith.constant 0 : i32
    %c0_i32_2 = arith.constant 0 : i32
    return %c0_i32, %c0_i32_0, %c0_i32_1 : i32, i32, i32
  }
  func.func @transform_11(%arg0: i32) -> (i32, i32, i32) {
    %c0_i32 = arith.constant 0 : i32
    %c0_i32_0 = arith.constant 0 : i32
    %c0_i32_1 = arith.constant 0 : i32
    %c0_i32_2 = arith.constant 0 : i32
    return %c0_i32, %c0_i32_0, %c0_i32_1 : i32, i32, i32
  }
  func.func @transform_12(%arg0: i32) -> (i32, i32) {
    %c0_i32 = arith.constant 0 : i32
    %c0_i32_0 = arith.constant 0 : i32
    %c0_i32_1 = arith.constant 0 : i32
    return %c0_i32, %c0_i32_0 : i32, i32
  }
  func.func @transform_13(%arg0: i32) -> (i32, i32) {
    %c0_i32 = arith.constant 0 : i32
    %c0_i32_0 = arith.constant 0 : i32
    %c0_i32_1 = arith.constant 0 : i32
    return %c0_i32, %c0_i32_0 : i32, i32
  }
  func.func @transform_14(%arg0: i32) -> (i32, i32) {
    %c0_i32 = arith.constant 0 : i32
    %c0_i32_0 = arith.constant 0 : i32
    %c0_i32_1 = arith.constant 0 : i32
    return %c0_i32, %c0_i32_0 : i32, i32
  }
  func.func @transform_15(%arg0: i32) -> (i32, i32, i32) {
    %c0_i32 = arith.constant 0 : i32
    %c0_i32_0 = arith.constant 0 : i32
    %c0_i32_1 = arith.constant 0 : i32
    return %arg0, %c0_i32, %c0_i32_0 : i32, i32, i32
  }
}

</mosaic_0001>

<bundles_post_ra>
// kernel: bert_classifier_forward.1
= control target key start
LH: loop header
LB: loop body
LE: loop exit
PB: predicated region body
PF: predicated region fallthrough
CT: control target
= control target key end

     0   :  { %s3802_s0 = inlined_call_operand.vmem [shape: f32[2,8,32], index: 0, kind: input, shape index: {}]   ;;  %s3803_s1 = inlined_call_operand.vmem [shape: f32[2,1,8], index: 1, kind: input, shape index: {}]   ;;  %s3804_s2 = inlined_call_operand.vmem [shape: f32[16,32], index: 2, kind: input, shape index: {}]   ;;  %s3805_s3 = inlined_call_operand.vmem [shape: f32[2,32], index: 3, kind: input, shape index: {}]   ;;  %s3806_s4 = inlined_call_operand.vmem [shape: f32[3,32], index: 4, kind: input, shape index: {}]   ;;  %s3807_s5 = inlined_call_operand.vmem [shape: bf16[2,32,96], index: 5, kind: input, shape index: {}]   ;;  %s3808_s6 = inlined_call_operand.vmem [shape: f32[2,1,96], index: 6, kind: input, shape index: {}]   ;;  %s3809_s7 = inlined_call_operand.vmem [shape: bf16[2,32,32], index: 7, kind: input, shape index: {}]   ;;  %s3810_s8 = inlined_call_operand.vmem [shape: f32[2,6,32], index: 8, kind: input, shape index: {}]   ;;  %s3811_s9 = inlined_call_operand.vmem [shape: bf16[2,32,64], index: 9, kind: input, shape index: {}]   ;;  %s3812_s10 = inlined_call_operand.vmem [shape: f32[2,1,64], index: 10, kind: input, shape index: {}]   ;;  %s3813_s11 = inlined_call_operand.vmem [shape: bf16[2,64,32], index: 11, kind: input, shape index: {}]   ;;  %s3814_s12 = inlined_call_operand.vmem [shape: bf16[32,32], index: 12, kind: input, shape index: {}]   ;;  %s3815_s13 = inlined_call_operand.vmem [shape: bf16[32,128], index: 13, kind: input, shape index: {}]   ;;  %s3816_s14 = inlined_call_operand.vmem [shape: f32[1,128], index: 14, kind: input, shape index: {}]   ;;  %s3817_s15 = inlined_call_operand.hbm [shape: f32[2,1,128], index: 15, kind: output, shape index: {}]  }
   0x1   :  { %3826 = sst [smem:[#allocation8_spill]] %s3802_s0 }
   0x2   :  { %3827 = sst [smem:[#allocation9_spill]] %s3803_s1 }
   0x3   :  { %20 = vsyncpa [#allocation3], 0 }
   0x4   :  { %22 = vsyncpa [#allocation3 + $0x1], 0  ;;  %s3262_s18 = smov 0   ;;  %s3264_s19 = smov 0  }
   0x5   :  { %s3266_s20 = smov 0   ;;  %s3268_s21 = smov 0  }
   0x6 LB: > { %3828 = sst [smem:[#allocation5_spill]] %s3168_s20  ;;  %s3283_s22 = sadd.s32 4294967295, %s3172_s21   ;;  %s3172_s21 = sphi %s3268_s21, %s3838_s21   ;;  %s3168_s20 = sphi %s3266_s20, %s3843_s20   ;;  %s3164_s19 = sphi %s3264_s19, %s3842_s19   ;;  %s3160_s18 = sphi %s3262_s18, %s3841_s18  }
   0x7   : > { %s2616_s23 = sadd.s32 4294967294, %s3172_s21   ;;  %s3287_s24 = sadd.s32 1, %s3172_s21  }
   0x8   : > { %3829 = sst [smem:[#allocation6_spill]] %s3287_s24  ;;  %s360_s25 = sadd.s32 1, %s3168_s20 }
   0x9   : > { %s357_s26 = ssub.s32 %s3172_s21, %s3287_s24  ;;  %p370_p0 = scmp.ne.s32.totalorder %s3168_s20, %s3164_s19 }
   0xa   : > { %p358_p1 = scmp.eq.s32.totalorder %s357_s26, 0  ;;  %p371_p2 = scmp.eq.s32.totalorder %s3283_s22, 1 }
   0xb   : > { %p376_p3 = scmp.ne.s32.totalorder %s3164_s19, %s3160_s18  ;;  %p377_p4 = scmp.eq.s32.totalorder %s2616_s23, 1 }
   0xc   : > { %s3298_s27 = scalar_select %p358_p1, %s3168_s20, %s360_s25  }
   0xd   : > { %p3300_p5 = por %p371_p2, %p370_p0  ;;  %p3304_p6 = por %p377_p4, %p376_p3 }
   0xe   : > { %3830 = sst [smem:[#allocation7_spill]] %s3298_s27  ;;  %p2619_p7 = scmp.ge.s32.totalorder %s3172_s21, 1 }
   0xf   : > { %p447_p8 = scmp.lt.s32.totalorder %s3172_s21, 3 }
  0x11   : > { %p448_p9 = pnand %p2619_p7, %p447_p8 }
  0x12   : > { %p496_p10 = scmp.lt.s32.totalorder (!%p448_p9), %s3283_s22, 1  ;;  %s3833_s0 = sld [smem:[#allocation8_spill]] (!%p448_p9) }
  0x13   : > { %451 = sbr.rel (%p448_p9) target bundleno = 4856 (0x12f8), region = 80  ;;  %s3825_s17 = smov (!%p448_p9), 104  }
  0x14   : > { %s3177_s23 = smov (!%p448_p9), 120   ;;  %s3178_s20 = smov (!%p448_p9), 112  }
  0x15   : > { %s3823_s24 = smov (!%p448_p9), 96   ;;  %s3834_s1 = sld [smem:[#allocation9_spill]] (!%p448_p9) }
  0x16   : > { %s3835_s26 = smov (!%p448_p9), 104  }
  0x18   : > { %s3312_s30 = scalar_select %p496_p10, %s3283_s22, 1  ;;  %v506_v0 = vld [vmem:[%s3804_s2] sm:$0xff]  ;;  %vm514_vm0 = vcmask 261120   ;;  %v3043_v8 = vld [vmem:[%s3807_s5 + $0x8] sm:$0xff]   ;;  %v3174_v9 = vmov 0.0   ;;  %vm3175_vm1 = vmmov 0   ;;  %v532_v19 = vlaneseq }
  0x19   : > { %v2621_v1 = vld [vmem:[%s3805_s3] ss:$0 sm:$0xff]  ;;  %2781 = vmatprep.subr.bf16.mxu0 %v3174_v9  ;;  %2785 = vmatprep.mubr.msk.bf16.mxu0 %vm3175_vm1, %v3174_v9  ;;  %vm634_vm2 = vcmask 64512   ;;  %vm881_vm3 = vcmask 1043456   ;;  %vm1408_vm4 = vcmask 523264  }
  0x1a   : > { %s2620_s16 = sshll.u32 %s3312_s30, 3  ;;  %2782 = vmatpush3.bf16.msra.mxu0 %v3043_v8  ;;  %v3044_v10 = vld [vmem:[%s3807_s5] sm:$0xff]   ;;  %2789 = vmatprep.subr.bf16.mxu1 %v3174_v9  ;;  %v3340_v20 = vshrl.u32 %v532_v19, 7 }
  0x1b   : > { %s499_s27 = scalar_lea.vmem %s3833_s0, %s2620_s16  ;;  %2783 = vmatprep.subr.bf16.mxu0 %v3174_v9  ;;  %2791 = vmatprep.mubr.msk.bf16.mxu1 %vm3175_vm1, %v3174_v9  ;;  %v504_v22 = vld [vmem:[%s3806_s4] sm:$0x7]  ;;  %s502_s25 = scalar_lea.vmem %s3834_s1, %s3312_s30 }
  0x1c   : > { %v505_v2 = vld [vmem:[%s499_s27] sm:$0xff]  ;;  %v3343_v21 = vsub.s32 0, %v3340_v20  ;;  %v3349_v23 = vsub.s32 1, %v3340_v20  ;;  %s3821_s30 = smov 64  }
  0x1d   : > { %v507_v3 = vadd.f32 %v506_v0, %v505_v2  ;;  %v2622_v32 = vld [vmem:[%s3808_s6] ss:$0 sm:$0xff] }
  0x1e   : > { %2784 = vmatpush3.bf16.msra.mxu0 %v3044_v10  ;;  %v535_v25 = vrot.slane %v504_v22, %v3343_v21  ;;  %v540_v28 = vrot.slane %v504_v22, %v3349_v23  ;;  %v3410_v53 = vld [vmem:[%s502_s25] ss:$0 sm:$0xff] }
  0x1f   : > { %v513_v4 = vadd.f32 %v2621_v1, %v507_v3  ;;  %2795 = vmatprep.subr.bf16.mxu0 %v3174_v9 }
  0x21   : > { %v515_v5 = vsel %vm514_vm0, %v513_v4, 0.0  ;;  %v520_v6 = vmul.f32 %v513_v4, %v513_v4 }
  0x22   : > { %516 = vadd.xlane.f32.xlu0 %v515_v5 }
  0x23   : > { %v521_v7 = vsel %vm514_vm0, %v520_v6, 0.0 }
  0x26   : > { %522 = vadd.xlane.f32.xlu0 %v521_v7 }
  0xab   : > { %v517_v11 = vpop.xlane.xlu0 %516 }
  0xac   : > { %v519_v12 = vmul.f32 0.03125, %v517_v11 }
  0xae   : > { %v525_v14 = vmul.f32 %v519_v12, %v519_v12  ;;  %v528_v24 = vsub.f32 %v513_v4, %v519_v12 }
  0xaf   : > { %v523_v13 = vpop.xlane.xlu0 %522 }
  0xb0   : > { %v524_v15 = vmul.f32 0.03125, %v523_v13 }
  0xb2   : > { %v526_v16 = vsub.f32 %v524_v15, %v525_v14 }
  0xb4   : > { %v527_v17 = vmax.f32 %v526_v16, 0.0 }
  0xb6   : > { %v529_v18 = vadd.f32 1e-12, %v527_v17 }
  0xb8   : > { %3063 = vrsqrt.f32 %v529_v18 }
  0xc5   : > { %v3064_v26 = vpop.eup %3063 }
  0xc6   : > { %v531_v27 = vmul.f32 %v3064_v26, %v528_v24 }
  0xc8   : > { %v536_v29 = vmul.f32 %v535_v25, %v531_v27 }
  0xca   : > { %v3353_v30 = vadd.f32 %v540_v28, %v536_v29 }
  0xcc   : > { %v548_v31 = vpack.c.bf16 %v3353_v30, %v3353_v30 }
  0xce   : > { %2786 = vmatmul.mubr.msk.bf16.vlgmr.msra.gmra.mxu0 %vm514_vm0, %v548_v31 }
  0xcf   : > { %2797 = vmatprep.mubr.msk.bf16.mxu0 %vm3175_vm1, %v3174_v9 }
 0x18e   : > { %v605_v33 = vpop.f32.mrf.mxu0 }
 0x18f   : > { %v606_v34 = vadd.f32 %v2622_v32, %v605_v33 }
 0x190   : > { %v2787_v35 = vpop.f32.mrf.mxu0 }
 0x191   : > { %618 = vrot.lane.b32.xlu0 %v606_v34, %s3825_s17  ;;  %612 = vrot.lane.b32.xlu1 %v606_v34, %s3177_s23  ;;  %v3366_v38 = vpack.c.bf16 %v606_v34, %v606_v34  ;;  %s3836_s17 = smov 96  }
 0x192   : > { %v608_v36 = vpop.f32.mrf.mxu0 }
 0x194   : > { %v2788_v37 = vpop.f32.mrf.mxu0 }
 0x195   : > { %615 = vrot.lane.b32.xlu1 %v606_v34, %s3178_s20 }
 0x199   : > { %632 = vrot.lane.b32.xlu1 %v3366_v38, %s3823_s24 }
 0x203   : > { %v613_v39 = vpop.permute.xlu1 %612  ;;  %v619_v43 = vpop.permute.xlu0 %618 }
 0x204   : > { %v3370_v40 = vpack.c.bf16 %v613_v39, %v613_v39  ;;  %v3378_v45 = vpack.c.bf16 %v619_v43, %v619_v43 }
 0x206   : > { %682 = vrot.lane.b32.xlu1 %v3370_v40, %s3823_s24 }
 0x207   : > { %v616_v41 = vpop.permute.xlu1 %615 }
 0x208   : > { %v3374_v42 = vpack.c.bf16 %v616_v41, %v616_v41 }
 0x20a   : > { %731 = vrot.lane.b32.xlu1 %v3374_v42, %s3823_s24 }
 0x20b   : > { %v633_v44 = vpop.permute.xlu1 %632 }
 0x20c   : > { %v639_v46 = vsel %vm634_vm2, %v633_v44, 0 }
 0x20d   : > { %2790 = vmatpush3.bf16.xpose.msra.mxu1 %v639_v46 }
 0x20e   : > { %780 = vrot.lane.b32.xlu1 %v3378_v45, %s3823_s24  ;;  %2801 = vmatprep.subr.bf16.mxu1 %v3174_v9  ;;  %s2702_s24 = sshll.u32 %s3283_s22, 4  ;;  %s3181_s22 = smov [#allocation2]  }
 0x20f   : > { %s3116_s0 = sshll.u32 %s3181_s22, 4  ;;  %s3117_s0 = int_to_ptr.vmem [resolvable:$false] %s3116_s0 }
 0x210   : > { %s3118_s16 = scalar_lea.vmem %s3117_s0, 32 }
 0x214   : > { %2792 = vmatmul.mubr.msk.bf16.vlgmr.msra.gmra.mxu1 %vm634_vm2, %v3366_v38 }
 0x215   : > { %2803 = vmatprep.mubr.msk.bf16.mxu1 %vm3175_vm1, %v3174_v9 }
 0x278   : > { %v683_v47 = vpop.permute.xlu1 %682 }
 0x279   : > { %v688_v48 = vsel %vm634_vm2, %v683_v47, 0 }
 0x27a   : > { %2796 = vmatpush3.bf16.xpose.msra.mxu0 %v688_v48 }
 0x27b   : > { %2807 = vmatprep.subr.bf16.mxu0 %v3174_v9 }
 0x27c   : > { %v732_v49 = vpop.permute.xlu1 %731 }
 0x27d   : > { %v737_v50 = vsel %vm634_vm2, %v732_v49, 0 }
 0x27e   : > { %2802 = vmatpush3.bf16.xpose.msra.mxu1 %v737_v50 }
 0x27f   : > { %2813 = vmatprep.subr.bf16.mxu1 %v3174_v9 }
 0x280   : > { %v781_v51 = vpop.permute.xlu1 %780 }
 0x281   : > { %v786_v52 = vsel %vm634_vm2, %v781_v51, 0  ;;  %2798 = vmatmul.mubr.msk.bf16.vlgmr.msra.gmra.mxu0 %vm634_vm2, %v3370_v40 }
 0x282   : > { %2808 = vmatpush3.bf16.xpose.msra.mxu0 %v786_v52  ;;  %2809 = vmatprep.mubr.msk.bf16.mxu0 %vm3175_vm1, %v3174_v9 }
 0x283   : > { %2819 = vmatprep.subr.bf16.mxu0 %v3174_v9 }
 0x285   : > { %2804 = vmatmul.mubr.msk.bf16.vlgmr.msra.gmra.mxu1 %vm634_vm2, %v3374_v42 }
 0x286   : > { %2815 = vmatprep.mubr.msk.bf16.mxu1 %vm3175_vm1, %v3174_v9 }
 0x289   : > { %2810 = vmatmul.mubr.msk.bf16.vlgmr.msra.gmra.mxu0 %vm634_vm2, %v3378_v45 }
 0x28a   : > { %2821 = vmatprep.mubr.msk.bf16.mxu0 %vm3175_vm1, %v3174_v9 }
 0x2d4   : > { %v675_v54 = vpop.f32.mrf.mxu1 }
 0x2d5   : > { %v676_v55 = vadd.f32 %v3410_v53, %v675_v54 }
 0x2d6   : > { %v2793_v56 = vpop.f32.mrf.mxu1 }
 0x2d7   : > { %v828_v57 = vsel %vm634_vm2, %v676_v55, -inf }
 0x2d8   : > { %829 = vmax.xlane.f32.xlu1 %v828_v57  ;;  %v678_v58 = vpop.f32.mrf.mxu1 }
 0x2d9   : > { %v1070_v58 = vld [vmem:[%s3809_s7 + $0x4] sm:$0xf] }
 0x2da   : > { %v2794_v59 = vpop.f32.mrf.mxu1 }
 0x341   : > { %v724_v60 = vpop.f32.mrf.mxu0 }
 0x342   : > { %v725_v61 = vadd.f32 %v3410_v53, %v724_v60 }
 0x343   : > { %v2799_v62 = vpop.f32.mrf.mxu0 }
 0x344   : > { %v831_v63 = vsel %vm634_vm2, %v725_v61, -inf  ;;  %v1079_v62 = vsel %vm881_vm3, %v1070_v58, 0 }
 0x345   : > { %v773_v0 = vpop.f32.mrf.mxu1  ;;  %832 = vmax.xlane.f32.xlu0 %v831_v63  ;;  %v727_v1 = vpop.f32.mrf.mxu0 }
 0x346   : > { %v774_v2 = vadd.f32 %v3410_v53, %v773_v0  ;;  %v1069_v0 = vld [vmem:[%s3809_s7] sm:$0xf] }
 0x347   : > { %v2800_v3 = vpop.f32.mrf.mxu0  ;;  %v2805_v4 = vpop.f32.mrf.mxu1 }
 0x348   : > { %v834_v5 = vsel %vm634_vm2, %v774_v2, -inf  ;;  %v1125_v3 = vsel %vm881_vm3, %v1069_v0, 0  ;;  %v1072_v4 = vld [vmem:[%s3809_s7 + $0xc] sm:$0xf] }
 0x349   : > { %835 = vmax.xlane.f32.xlu1 %v834_v5  ;;  %v776_v6 = vpop.f32.mrf.mxu1  ;;  %v822_v7 = vpop.f32.mrf.mxu0 }
 0x34a   : > { %v823_v8 = vadd.f32 %v3410_v53, %v822_v7  ;;  %v1220_v7 = vsel %vm881_vm3, %v1072_v4, 0 }
 0x34b   : > { %v2806_v10 = vpop.f32.mrf.mxu1  ;;  %v2811_v11 = vpop.f32.mrf.mxu0 }
 0x34c   : > { %v837_v12 = vsel %vm634_vm2, %v823_v8, -inf }
 0x34d   : > { %838 = vmax.xlane.f32.xlu0 %v837_v12  ;;  %v825_v13 = vpop.f32.mrf.mxu0  ;;  %v1071_v12 = vld [vmem:[%s3809_s7 + $0x8] sm:$0xf] }
 0x34f   : > { %v2812_v14 = vpop.f32.mrf.mxu0 }
 0x35a   : > { %876 = vrot.lane.b32.xlu1 %v3366_v38, %s3821_s30 }
 0x361   : > { %v830_v15 = vpop.xlane.xlu1 %829 }
 0x362   : > { %v840_v16 = vsub.f32 %v676_v55, %v830_v15  ;;  %v1172_v15 = vsel %vm881_vm3, %v1071_v12, 0 }
 0x364   : > { %v844_v17 = vmul.f32 1.442695, %v840_v16 }
 0x366   : > { %3065 = vpow2.f32 %v844_v17 }
 0x373   : > { %v3066_v18 = vpop.eup %3065 }
 0x374   : > { %v852_v19 = vsel %vm634_vm2, %v3066_v18, 0.0 }
 0x37e   : > { %853 = vadd.xlane.f32.xlu1 %v852_v19 }
 0x3ce   : > { %v833_v22 = vpop.xlane.xlu0 %832 }
 0x3cf   : > { %v841_v24 = vsub.f32 %v725_v61, %v833_v22 }
 0x3d1   : > { %v846_v25 = vmul.f32 1.442695, %v841_v24 }
 0x3d2   : > { %v836_v26 = vpop.xlane.xlu1 %835 }
 0x3d3   : > { %3067 = vpow2.f32 %v846_v25  ;;  %v842_v27 = vsub.f32 %v774_v2, %v836_v26 }
 0x3d5   : > { %v848_v28 = vmul.f32 1.442695, %v842_v27 }
 0x3d6   : > { %v877_v29 = vpop.permute.xlu1 %876  ;;  %v839_v31 = vpop.xlane.xlu0 %838 }
 0x3d7   : > { %3069 = vpow2.f32 %v848_v28  ;;  %v883_v32 = vsel %vm881_vm3, %v877_v29, 0  ;;  %v843_v33 = vsub.f32 %v823_v8, %v839_v31 }
 0x3d8   : > { %2814 = vmatpush3.bf16.msra.mxu1 %v883_v32 }
 0x3d9   : > { %v850_v34 = vmul.f32 1.442695, %v843_v33  ;;  %2825 = vmatprep.subr.bf16.mxu1 %v3174_v9 }
 0x3db   : > { %3071 = vpow2.f32 %v850_v34 }
 0x3e0   : > { %v3068_v35 = vpop.eup %3067 }
 0x3e1   : > { %v855_v36 = vsel %vm634_vm2, %v3068_v35, 0.0 }
 0x3e2   : > { %856 = vadd.xlane.f32.xlu0 %v855_v36 }
 0x3e4   : > { %v3070_v37 = vpop.eup %3069 }
 0x3e5   : > { %v858_v38 = vsel %vm634_vm2, %v3070_v37, 0.0 }
 0x3e6   : > { %859 = vadd.xlane.f32.xlu1 %v858_v38 }
 0x3e8   : > { %v3072_v39 = vpop.eup %3071 }
 0x3e9   : > { %v861_v41 = vsel %vm634_vm2, %v3072_v39, 0.0 }
 0x3ea   : > { %862 = vadd.xlane.f32.xlu0 %v861_v41 }
 0x3f7   : > { %973 = vrot.lane.b32.xlu1 %v3374_v42, %s3821_s30 }
 0x3fb   : > { %1021 = vrot.lane.b32.xlu1 %v3378_v45, %s3821_s30 }
 0x400   : > { %925 = vrot.lane.b32.xlu0 %v3370_v40, %s3821_s30 }
 0x407   : > { %v854_v43 = vpop.xlane.xlu1 %853 }
 0x408   : > { %3073 = vrcp.f32 %v854_v43  ;;  %v3487_v43 = vld [vmem:[%s3810_s8] sm:$0x3f] }
 0x415   : > { %v3074_v44 = vpop.eup %3073 }
 0x416   : > { %v868_v46 = vmul.f32 %v3074_v44, %v3066_v18 }
 0x418   : > { %v872_v47 = vpack.c.bf16 %v868_v46, %v868_v46 }
 0x41a   : > { %2816 = vmatmul.mubr.msk.bf16.vlgmr.msra.gmra.mxu1 %vm634_vm2, %v872_v47 }
 0x41b   : > { %2827 = vmatprep.mubr.msk.bf16.mxu1 %vm3175_vm1, %v3174_v9 }
 0x46b   : > { %v857_v48 = vpop.xlane.xlu0 %856 }
 0x46c   : > { %3075 = vrcp.f32 %v857_v48 }
 0x46f   : > { %v860_v49 = vpop.xlane.xlu1 %859 }
 0x470   : > { %3077 = vrcp.f32 %v860_v49  ;;  %v1266_v49 = vrot.slane %v3487_v43, %v3343_v21 }
 0x473   : > { %v974_v42 = vpop.permute.xlu1 %973  ;;  %v863_v50 = vpop.xlane.xlu0 %862 }
 0x474   : > { %v979_v45 = vsel %vm881_vm3, %v974_v42, 0  ;;  %3079 = vrcp.f32 %v863_v50 }
 0x475   : > { %2826 = vmatpush3.bf16.msra.mxu1 %v979_v45 }
 0x476   : > { %2837 = vmatprep.subr.bf16.mxu1 %v3174_v9 }
 0x477   : > { %v926_v40 = vpop.permute.xlu0 %925  ;;  %v1022_v55 = vpop.permute.xlu1 %1021 }
 0x478   : > { %v931_v51 = vsel %vm881_vm3, %v926_v40, 0  ;;  %v1027_v59 = vsel %vm881_vm3, %v1022_v55, 0 }
 0x479   : > { %v3076_v52 = vpop.eup %3075  ;;  %2820 = vmatpush3.bf16.msra.mxu0 %v931_v51 }
 0x47a   : > { %2831 = vmatprep.subr.bf16.mxu0 %v3174_v9  ;;  %v869_v54 = vmul.f32 %v3076_v52, %v3068_v35 }
 0x47c   : > { %v873_v56 = vpack.c.bf16 %v869_v54, %v869_v54 }
 0x47d   : > { %v3078_v57 = vpop.eup %3077 }
 0x47e   : > { %2822 = vmatmul.mubr.msk.bf16.vlgmr.msra.gmra.mxu0 %vm634_vm2, %v873_v56  ;;  %v870_v60 = vmul.f32 %v3078_v57, %v3070_v37 }
 0x47f   : > { %2832 = vmatpush3.bf16.msra.mxu0 %v1027_v59  ;;  %2833 = vmatprep.mubr.msk.bf16.mxu0 %vm3175_vm1, %v3174_v9 }
 0x480   : > { %v874_v61 = vpack.c.bf16 %v870_v60, %v870_v60  ;;  %2843 = vmatprep.subr.bf16.mxu0 %v3174_v9  ;;  %v3045_v60 = vld [vmem:[%s3811_s9 + $0x8] sm:$0xff]  }
 0x481   : > { %v3080_v63 = vpop.eup %3079 }
 0x482   : > { %2828 = vmatmul.mubr.msk.bf16.vlgmr.msra.gmra.mxu1 %vm634_vm2, %v874_v61  ;;  %v871_v1 = vmul.f32 %v3080_v63, %v3072_v39  ;;  %v3046_v61 = vld [vmem:[%s3811_s9] sm:$0xff]  }
 0x483   : > { %2838 = vmatpush3.bf16.msra.mxu1 %v1079_v62  ;;  %2839 = vmatprep.mubr.msk.bf16.mxu1 %vm3175_vm1, %v3174_v9 }
 0x484   : > { %v875_v2 = vpack.c.bf16 %v871_v1, %v871_v1  ;;  %2849 = vmatprep.subr.bf16.mxu1 %v3174_v9 }
 0x486   : > { %2834 = vmatmul.mubr.msk.bf16.vlgmr.msra.gmra.mxu0 %vm634_vm2, %v875_v2 }
 0x487   : > { %2844 = vmatpush3.bf16.msra.mxu0 %v1125_v3  ;;  %2845 = vmatprep.mubr.msk.bf16.mxu0 %vm3175_vm1, %v3174_v9 }
 0x488   : > { %2855 = vmatprep.subr.bf16.mxu0 %v3174_v9 }
 0x4da   : > { %v919_v5 = vpop.f32.mrf.mxu1 }
 0x4db   : > { %v1073_v6 = vpack.c.bf16 %v919_v5, %v919_v5  ;;  %v1292_v5 = vsub.s32 2, %v3340_v20 }
 0x4dc   : > { %v2817_v8 = vpop.f32.mrf.mxu1 }
 0x4dd   : > { %2846 = vmatmul.mubr.msk.bf16.vlgmr.msra.gmra.mxu0 %vm634_vm2, %v1073_v6 }
 0x4de   : > { %v922_v10 = vpop.f32.mrf.mxu1  ;;  %2856 = vmatpush3.bf16.msra.mxu0 %v1220_v7  ;;  %2857 = vmatprep.mubr.msk.bf16.mxu0 %vm3175_vm1, %v3174_v9  ;;  %v1288_v7 = vrot.slane %v3487_v43, %v3349_v23 }
 0x4df   : > { %2869 = vmatprep.subr.bf16.mxu0 %v3174_v9 }
 0x4e0   : > { %v2818_v11 = vpop.f32.mrf.mxu1 }
 0x4e1   : > { %v1293_v11 = vrot.slane %v3487_v43, %v1292_v5 }
 0x53e   : > { %v967_v13 = vpop.f32.mrf.mxu0 }
 0x53f   : > { %v1074_v14 = vpack.c.bf16 %v967_v13, %v967_v13 }
 0x540   : > { %v2823_v16 = vpop.f32.mrf.mxu0 }
 0x541   : > { %2840 = vmatmul.mubr.msk.bf16.vlgmr.msra.gmra.mxu1 %vm634_vm2, %v1074_v14  ;;  %v3048_v16 = vld [vmem:[%s3813_s11 + $0x10] sm:$0xff]  }
 0x542   : > { %v970_v17 = vpop.f32.mrf.mxu0  ;;  %v1015_v18 = vpop.f32.mrf.mxu1  ;;  %2850 = vmatpush3.bf16.msra.mxu1 %v1172_v15  ;;  %2851 = vmatprep.mubr.msk.bf16.mxu1 %vm3175_vm1, %v3174_v9  ;;  %v3047_v15 = vld [vmem:[%s3813_s11 + $0x18] sm:$0xff]  }
 0x543   : > { %2861 = vmatprep.subr.bf16.mxu1 %v3174_v9  ;;  %v1167_v26 = vpack.c.bf16 %v1015_v18, %v1015_v18  ;;  %v3049_v17 = vld [vmem:[%s3813_s11 + $0x8] sm:$0xff]   ;;  %v3050_v18 = vld [vmem:[%s3813_s11] sm:$0xff]  }
 0x544   : > { %v2824_v19 = vpop.f32.mrf.mxu0  ;;  %v2829_v22 = vpop.f32.mrf.mxu1 }
 0x545   : > { %v2639_v19 = vld [vmem:[%s3812_s10] ss:$0 sm:$0xff] }
 0x546   : > { %v1018_v24 = vpop.f32.mrf.mxu1  ;;  %v1063_v25 = vpop.f32.mrf.mxu0 }
 0x547   : > { %v1215_v27 = vpack.c.bf16 %v1063_v25, %v1063_v25 }
 0x548   : > { %v2830_v28 = vpop.f32.mrf.mxu1  ;;  %v2835_v29 = vpop.f32.mrf.mxu0 }
 0x549   : > { %2852 = vmatmul.mubr.msk.bf16.vlgmr.msra.gmra.mxu1 %vm634_vm2, %v1167_v26  ;;  %2858 = vmatmul.mubr.msk.bf16.vlgmr.msra.gmra.mxu0 %vm634_vm2, %v1215_v27 }
 0x54a   : > { %v1066_v31 = vpop.f32.mrf.mxu0  ;;  %2865 = vmatprep.mubr.msk.bf16.mxu1 %vm3175_vm1, %v3174_v9  ;;  %2877 = vmatprep.mubr.msk.bf16.mxu0 %vm3175_vm1, %v3174_v9 }
 0x54b   : > { %2862 = vmatpush3.bf16.msra.mxu1 %v3045_v60  ;;  %2870 = vmatpush3.bf16.msra.mxu0 %v3047_v15 }
 0x54c   : > { %v2836_v32 = vpop.f32.mrf.mxu0  ;;  %2863 = vmatprep.subr.bf16.mxu1 %v3174_v9  ;;  %2871 = vmatprep.subr.bf16.mxu0 %v3174_v9 }
 0x54f   : > { %2864 = vmatpush3.bf16.msra.mxu1 %v3046_v61  ;;  %2872 = vmatpush3.bf16.msra.mxu0 %v3048_v16 }
 0x550   : > { %2881 = vmatprep.subr.bf16.mxu1 %v3174_v9  ;;  %2873 = vmatprep.subr.bf16.mxu0 %v3174_v9 }
 0x553   : > { %2874 = vmatpush3.bf16.msra.mxu0 %v3049_v17 }
 0x554   : > { %2875 = vmatprep.subr.bf16.mxu0 %v3174_v9 }
 0x557   : > { %2876 = vmatpush3.bf16.msra.mxu0 %v3050_v18 }
 0x558   : > { %2895 = vmatprep.subr.bf16.mxu0 %v3174_v9 }
 0x59d   : > { %v1161_v33 = vpop.f32.mrf.mxu0 }
 0x59f   : > { %v2847_v34 = vpop.f32.mrf.mxu0 }
 0x5a1   : > { %v1164_v35 = vpop.f32.mrf.mxu0 }
 0x5a3   : > { %v2848_v36 = vpop.f32.mrf.mxu0 }
 0x601   : > { %v1115_v37 = vpop.f32.mrf.mxu1 }
 0x602   : > { %v1162_v44 = vadd.f32 %v1161_v33, %v1115_v37 }
 0x603   : > { %v2841_v38 = vpop.f32.mrf.mxu1 }
 0x605   : > { %v1118_v39 = vpop.f32.mrf.mxu1 }
 0x606   : > { %v1382_v39 = vsub.s32 3, %v3340_v20 }
 0x607   : > { %v2842_v41 = vpop.f32.mrf.mxu1 }
 0x608   : > { %v1383_v41 = vrot.slane %v3487_v43, %v1382_v39 }
 0x609   : > { %v1208_v46 = vpop.f32.mrf.mxu1  ;;  %v1256_v47 = vpop.f32.mrf.mxu0 }
 0x60a   : > { %v1214_v48 = vadd.f32 %v1208_v46, %v1162_v44 }
 0x60b   : > { %v2853_v42 = vpop.f32.mrf.mxu1  ;;  %v2859_v50 = vpop.f32.mrf.mxu0 }
 0x60c   : > { %v1262_v45 = vadd.f32 %v1256_v47, %v1214_v48 }
 0x60d   : > { %v1211_v40 = vpop.f32.mrf.mxu1  ;;  %v1259_v51 = vpop.f32.mrf.mxu0 }
 0x60e   : > { %v1267_v52 = vadd.f32 %v1266_v49, %v1262_v45  ;;  %v3051_v51 = vld [vmem:[%s3807_s5 + $0x18] sm:$0xff]  }
 0x60f   : > { %v2854_v54 = vpop.f32.mrf.mxu1  ;;  %v2860_v55 = vpop.f32.mrf.mxu0 }
 0x610   : > { %v1268_v56 = vadd.f32 %v1267_v52, %v3353_v30  ;;  %v3052_v52 = vld [vmem:[%s3807_s5 + $0x10] sm:$0xff]  }
 0x612   : > { %v1269_v57 = vsel %vm514_vm0, %v1268_v56, 0.0  ;;  %v1273_v58 = vmul.f32 %v1268_v56, %v1268_v56 }
 0x613   : > { %1270 = vadd.xlane.f32.xlu0 %v1269_v57 }
 0x614   : > { %v1274_v59 = vsel %vm514_vm0, %v1273_v58, 0.0 }
 0x615   : > { %1275 = vadd.xlane.f32.xlu1 %v1274_v59 }
 0x69c   : > { %v1271_v30 = vpop.xlane.xlu0 %1270 }
 0x69d   : > { %v1272_v62 = vmul.f32 0.03125, %v1271_v30  ;;  %v1471_v30 = vsub.s32 4, %v3340_v20 }
 0x69e   : > { %v1276_v63 = vpop.xlane.xlu1 %1275 }
 0x69f   : > { %v1278_v0 = vmul.f32 %v1272_v62, %v1272_v62  ;;  %v1277_v1 = vmul.f32 0.03125, %v1276_v63  ;;  %v1281_v6 = vsub.f32 %v1268_v56, %v1272_v62  ;;  %v1476_v62 = vsub.s32 5, %v3340_v20  ;;  %v3062_v20 = vld [vmem:[%s3815_s13] sm:$0xff]  }
 0x6a1   : > { %v1279_v2 = vsub.f32 %v1277_v1, %v1278_v0  ;;  %v1472_v0 = vrot.slane %v3487_v43, %v1471_v30 }
 0x6a3   : > { %v1280_v3 = vmax.f32 %v1279_v2, 0.0 }
 0x6a5   : > { %v1282_v4 = vadd.f32 1e-12, %v1280_v3  ;;  %v1477_v3 = vrot.slane %v3487_v43, %v1476_v62 }
 0x6a7   : > { %3081 = vrsqrt.f32 %v1282_v4 }
 0x6b4   : > { %v3082_v8 = vpop.eup %3081 }
 0x6b5   : > { %v1284_v10 = vmul.f32 %v3082_v8, %v1281_v6  ;;  %v2654_v8 = vld [vmem:[%s3808_s6 + $0x1] ss:$0 sm:$0xff] }
 0x6b7   : > { %v1289_v12 = vmul.f32 %v1288_v7, %v1284_v10 }
 0x6b9   : > { %v1294_v13 = vadd.f32 %v1293_v11, %v1289_v12 }
 0x6bb   : > { %v1299_v14 = vpack.c.bf16 %v1294_v13, %v1294_v13 }
 0x6bd   : > { %2866 = vmatmul.mubr.msk.bf16.vlgmr.msra.gmra.mxu1 %vm514_vm0, %v1299_v14 }
 0x6be   : > { %2885 = vmatprep.mubr.msk.bf16.mxu1 %vm3175_vm1, %v3174_v9  ;;  %2882 = vmatpush3.bf16.msra.mxu1 %v3051_v51 }
 0x6bf   : > { %2883 = vmatprep.subr.bf16.mxu1 %v3174_v9 }
 0x6c2   : > { %2884 = vmatpush3.bf16.msra.mxu1 %v3052_v52 }
 0x6c3   : > { %2889 = vmatprep.subr.bf16.mxu1 %v3174_v9 }
 0x77d   : > { %v1356_v22 = vpop.f32.mrf.mxu1 }
 0x77e   : > { %v1357_v24 = vadd.f32 %v2639_v19, %v1356_v22 }
 0x77f   : > { %v2867_v25 = vpop.f32.mrf.mxu1 }
 0x780   : > { %v1362_v26 = vmul.f32 %v1357_v24, %v1357_v24 }
 0x781   : > { %v1359_v27 = vpop.f32.mrf.mxu1 }
 0x782   : > { %v1363_v28 = vmul.f32 %v1362_v26, %v1357_v24 }
 0x783   : > { %v2868_v29 = vpop.f32.mrf.mxu1 }
 0x784   : > { %v1364_v31 = vmul.f32 0.044715, %v1363_v28 }
 0x786   : > { %v1365_v32 = vadd.f32 %v1364_v31, %v1357_v24 }
 0x788   : > { %v1366_v33 = vmul.f32 0.7978846, %v1365_v32 }
 0x78a   : > { %3083 = vtanh.f32 %v1366_v33 }
 0x797   : > { %v3084_v34 = vpop.eup %3083 }
 0x798   : > { %v1368_v35 = vadd.f32 1.0, %v3084_v34 }
 0x79a   : > { %v1369_v36 = vmul.f32 0.5, %v1368_v35 }
 0x79c   : > { %v1370_v37 = vmul.f32 %v1369_v36, %v1357_v24 }
 0x79e   : > { %v1379_v38 = vpack.c.bf16 %v1370_v37, %v1370_v37 }
 0x7a0   : > { %2878 = vmatmul.mubr.msk.bf16.vlgmr.msra.gmra.mxu0 %vm1408_vm4, %v1379_v38 }
 0x7a1   : > { %2897 = vmatprep.mubr.msk.bf16.mxu0 %vm3175_vm1, %v3174_v9 }
 0x860   : > { %v1446_v44 = vpop.f32.mrf.mxu0 }
 0x861   : > { %v1447_v46 = vadd.f32 %v1446_v44, %v1383_v41 }
 0x862   : > { %v2879_v47 = vpop.f32.mrf.mxu0 }
 0x863   : > { %v1452_v48 = vadd.f32 %v1447_v46, %v1294_v13 }
 0x864   : > { %v1449_v49 = vpop.f32.mrf.mxu0 }
 0x865   : > { %v1453_v42 = vsel %vm514_vm0, %v1452_v48, 0.0  ;;  %v1457_v50 = vmul.f32 %v1452_v48, %v1452_v48 }
 0x866   : > { %1454 = vadd.xlane.f32.xlu0 %v1453_v42  ;;  %v2880_v45 = vpop.f32.mrf.mxu0 }
 0x867   : > { %v1458_v40 = vsel %vm514_vm0, %v1457_v50, 0.0 }
 0x86a   : > { %1459 = vadd.xlane.f32.xlu0 %v1458_v40 }
 0x8ef   : > { %v1455_v54 = vpop.xlane.xlu0 %1454 }
 0x8f0   : > { %v1456_v55 = vmul.f32 0.03125, %v1455_v54 }
 0x8f2   : > { %v1462_v57 = vmul.f32 %v1456_v55, %v1456_v55  ;;  %v1465_v63 = vsub.f32 %v1452_v48, %v1456_v55 }
 0x8f3   : > { %v1460_v56 = vpop.xlane.xlu0 %1459 }
 0x8f4   : > { %v1461_v58 = vmul.f32 0.03125, %v1460_v56 }
 0x8f6   : > { %v1463_v59 = vsub.f32 %v1461_v58, %v1462_v57 }
 0x8f8   : > { %v1464_v60 = vmax.f32 %v1463_v59, 0.0 }
 0x8fa   : > { %v1466_v61 = vadd.f32 1e-12, %v1464_v60 }
 0x8fc   : > { %3085 = vrsqrt.f32 %v1466_v61 }
 0x909   : > { %v3086_v1 = vpop.eup %3085 }
 0x90a   : > { %v1468_v2 = vmul.f32 %v3086_v1, %v1465_v63 }
 0x90c   : > { %v1473_v4 = vmul.f32 %v1472_v0, %v1468_v2 }
 0x90e   : > { %v3555_v6 = vadd.f32 %v1477_v3, %v1473_v4 }
 0x910   : > { %v1486_v7 = vpack.c.bf16 %v3555_v6, %v3555_v6 }
 0x912   : > { %2886 = vmatmul.mubr.msk.bf16.vlgmr.msra.gmra.mxu1 %vm514_vm0, %v1486_v7 }
 0x913   : > { %2891 = vmatprep.mubr.msk.bf16.mxu1 %vm3175_vm1, %v3174_v9 }
 0x9d2   : > { %v1544_v10 = vpop.f32.mrf.mxu1 }
 0x9d3   : > { %v1545_v11 = vadd.f32 %v2654_v8, %v1544_v10 }
 0x9d4   : > { %v2887_v12 = vpop.f32.mrf.mxu1 }
 0x9d5   : > { %1554 = vrot.lane.b32.xlu0 %v1545_v11, %s3178_s20  ;;  %1551 = vrot.lane.b32.xlu1 %v1545_v11, %s3177_s23  ;;  %v3568_v14 = vpack.c.bf16 %v1545_v11, %v1545_v11  ;;  %s3837_s23 = smov 64  }
 0x9d6   : > { %v1547_v43 = vpop.f32.mrf.mxu1 }
 0x9d8   : > { %v2888_v13 = vpop.f32.mrf.mxu1 }
 0x9d9   : > { %1557 = vrot.lane.b32.xlu1 %v1545_v11, %s3835_s26  ;;  %s3761_s26 = scalar_lea.hbm %s3817_s15, %s2702_s24 }
 0x9dd   : > { %1565 = vrot.lane.b32.xlu1 %v3568_v14, %s3836_s17 }
 0xa47   : > { %v1555_v15 = vpop.permute.xlu0 %1554  ;;  %v1552_v16 = vpop.permute.xlu1 %1551 }
 0xa48   : > { %v3572_v17 = vpack.c.bf16 %v1555_v15, %v1555_v15  ;;  %v1561_v18 = vpack.c.bf16 %v1552_v16, %v1552_v16 }
 0xa4a   : > { %1614 = vrot.lane.b32.xlu0 %v1561_v18, %s3836_s17  ;;  %1663 = vrot.lane.b32.xlu1 %v3572_v17, %s3836_s17 }
 0xa4b   : > { %v1558_v19 = vpop.permute.xlu1 %1557 }
 0xa4c   : > { %v3577_v22 = vpack.c.bf16 %v1558_v19, %v1558_v19 }
 0xa4e   : > { %1712 = vrot.lane.b32.xlu0 %v3577_v22, %s3836_s17  ;;  %s494_s17 = sand.u32 1, %s3164_s19  }
 0xa4f   : > { %v1566_v24 = vpop.permute.xlu1 %1565  ;;  %s495_s30 = scalar_lea.vmem [#allocation2], %s494_s17 }
 0xa50   : > { %v1571_v25 = vsel %vm634_vm2, %v1566_v24, 0  ;;  %s2552_s27 = sshll.u32 %s495_s30, 4  ;;  %s3763_s27 = int_to_ptr.vmem [resolvable:$true] %s2552_s27 }
 0xa51   : > { %2890 = vmatpush3.bf16.xpose.msra.mxu1 %v1571_v25  ;;  %s3112_s20 = scalar_lea.vmem %s3763_s27, 16  ;;  %p3119_p0 = scmp.lt.s32.totalorder %s3763_s27, %s3117_s0 }
 0xa52   : > { %2901 = vmatprep.subr.bf16.mxu1 %v3174_v9  ;;  %p3113_p11 = scmp.ne.s32.totalorder %s3763_s27, %s3112_s20  ;;  %p3120_p1 = scmp.lt.s32.totalorder %s3118_s16, %s3112_s20 }
 0xa54   : > { %p3114_p12 = pnand %p3113_p11, %p3300_p5  ;;  %p3121_p2 = por %p3120_p1, %p3119_p0 }
 0xa56   : > { %p3115_p13 = pneg %p3114_p12 }
 0xa58   : > { %2892 = vmatmul.mubr.msk.bf16.vlgmr.msra.gmra.mxu1 %vm634_vm2, %v3568_v14  ;;  %p3122_p3 = pnand %p3121_p2, %p3115_p13 }
 0xa59   : > { %2903 = vmatprep.mubr.msk.bf16.mxu1 %vm3175_vm1, %v3174_v9 }
 0xabc   : > { %v1615_v26 = vpop.permute.xlu0 %1614  ;;  %v1664_v27 = vpop.permute.xlu1 %1663 }
 0xabd   : > { %v1620_v28 = vsel %vm634_vm2, %v1615_v26, 0  ;;  %v1669_v29 = vsel %vm634_vm2, %v1664_v27, 0 }
 0xabe   : > { %2896 = vmatpush3.bf16.xpose.msra.mxu0 %v1620_v28  ;;  %2902 = vmatpush3.bf16.xpose.msra.mxu1 %v1669_v29 }
 0xabf   : > { %2907 = vmatprep.subr.bf16.mxu0 %v3174_v9  ;;  %2913 = vmatprep.subr.bf16.mxu1 %v3174_v9 }
 0xac0   : > { %v1713_v31 = vpop.permute.xlu0 %1712 }
 0xac1   : > { %v1718_v32 = vsel %vm634_vm2, %v1713_v31, 0 }
 0xac5   : > { %2898 = vmatmul.mubr.msk.bf16.vlgmr.msra.gmra.mxu0 %vm634_vm2, %v1561_v18  ;;  %2904 = vmatmul.mubr.msk.bf16.vlgmr.msra.gmra.mxu1 %vm634_vm2, %v3572_v17 }
 0xac6   : > { %2908 = vmatpush3.bf16.xpose.msra.mxu0 %v1718_v32  ;;  %2909 = vmatprep.mubr.msk.bf16.mxu0 %vm3175_vm1, %v3174_v9 }
 0xac7   : > { %2919 = vmatprep.subr.bf16.mxu0 %v3174_v9  ;;  %2915 = vmatprep.mubr.msk.bf16.mxu1 %vm3175_vm1, %v3174_v9 }
 0xacd   : > { %2910 = vmatmul.mubr.msk.bf16.vlgmr.msra.gmra.mxu0 %vm634_vm2, %v3577_v22 }
 0xace   : > { %2921 = vmatprep.mubr.msk.bf16.mxu0 %vm3175_vm1, %v3174_v9 }
 0xb18   : > { %v1607_v33 = vpop.f32.mrf.mxu1 }
 0xb19   : > { %v1608_v34 = vadd.f32 %v3410_v53, %v1607_v33 }
 0xb1a   : > { %v2893_v35 = vpop.f32.mrf.mxu1 }
 0xb1b   : > { %v1760_v36 = vsel %vm634_vm2, %v1608_v34, -inf }
 0xb1c   : > { %1761 = vmax.xlane.f32.xlu1 %v1760_v36  ;;  %v1610_v37 = vpop.f32.mrf.mxu1 }
 0xb1e   : > { %v2894_v38 = vpop.f32.mrf.mxu1 }
 0xb85   : > { %v1656_v41 = vpop.f32.mrf.mxu0  ;;  %v1705_v44 = vpop.f32.mrf.mxu1 }
 0xb86   : > { %v1657_v46 = vadd.f32 %v3410_v53, %v1656_v41  ;;  %v1706_v49 = vadd.f32 %v3410_v53, %v1705_v44  ;;  %v2667_v44 = vld [vmem:[%s3809_s7 + $0x14] sm:$0xf] }
 0xb87   : > { %v2899_v47 = vpop.f32.mrf.mxu0  ;;  %v2905_v48 = vpop.f32.mrf.mxu1 }
 0xb88   : > { %v1763_v42 = vsel %vm634_vm2, %v1657_v46, -inf  ;;  %v1766_v52 = vsel %vm634_vm2, %v1706_v49, -inf }
 0xb89   : > { %v1708_v50 = vpop.f32.mrf.mxu1  ;;  %1764 = vmax.xlane.f32.xlu0 %v1763_v42  ;;  %v1659_v45 = vpop.f32.mrf.mxu0 }
 0xb8a   : > { %v2666_v50 = vld [vmem:[%s3809_s7 + $0x10] sm:$0xf] }
 0xb8b   : > { %v2900_v40 = vpop.f32.mrf.mxu0  ;;  %v2906_v51 = vpop.f32.mrf.mxu1 }
 0xb8c   : > { %v2057_v51 = vsel %vm881_vm3, %v2666_v50, 0 }
 0xb8d   : > { %1767 = vmax.xlane.f32.xlu0 %v1766_v52  ;;  %v1754_v54 = vpop.f32.mrf.mxu0  ;;  %v2669_v52 = vld [vmem:[%s3809_s7 + $0x1c] sm:$0xf] }
 0xb8e   : > { %v1755_v55 = vadd.f32 %v3410_v53, %v1754_v54 }
 0xb8f   : > { %v2911_v56 = vpop.f32.mrf.mxu0 }
 0xb90   : > { %v1769_v57 = vsel %vm634_vm2, %v1755_v55, -inf  ;;  %v2152_v56 = vsel %vm881_vm3, %v2669_v52, 0 }
 0xb91   : > { %1770 = vmax.xlane.f32.xlu1 %v1769_v57  ;;  %v1757_v58 = vpop.f32.mrf.mxu0 }
 0xb93   : > { %v2912_v59 = vpop.f32.mrf.mxu0 }
 0xba2   : > { %1856 = vrot.lane.b32.xlu1 %v1561_v18, %s3837_s23 }
 0xba5   : > { %v1762_v60 = vpop.xlane.xlu1 %1761 }
 0xba6   : > { %v1772_v61 = vsub.f32 %v1608_v34, %v1762_v60  ;;  %v2668_v60 = vld [vmem:[%s3809_s7 + $0x18] sm:$0xf] }
 0xba8   : > { %v1776_v63 = vmul.f32 1.442695, %v1772_v61 }
 0xbaa   : > { %3087 = vpow2.f32 %v1776_v63 }
 0xbb7   : > { %v3088_v0 = vpop.eup %3087 }
 0xbb8   : > { %v1784_v1 = vsel %vm634_vm2, %v3088_v0, 0.0 }
 0xbb9   : > { %1785 = vadd.xlane.f32.xlu0 %v1784_v1 }
 0xbcf   : > { %1808 = vrot.lane.b32.xlu0 %v3568_v14, %s3837_s23 }
 0xc12   : > { %v1765_v53 = vpop.xlane.xlu0 %1764 }
 0xc13   : > { %v1773_v2 = vsub.f32 %v1657_v46, %v1765_v53 }
 0xc15   : > { %v1778_v3 = vmul.f32 1.442695, %v1773_v2 }
 0xc16   : > { %v1768_v4 = vpop.xlane.xlu0 %1767 }
 0xc17   : > { %3089 = vpow2.f32 %v1778_v3  ;;  %v1774_v7 = vsub.f32 %v1706_v49, %v1768_v4  ;;  %v2011_v49 = vsel %vm881_vm3, %v2667_v44, 0 }
 0xc19   : > { %v1780_v8 = vmul.f32 1.442695, %v1774_v7 }
 0xc1a   : > { %v1771_v10 = vpop.xlane.xlu1 %1770 }
 0xc1b   : > { %3091 = vpow2.f32 %v1780_v8  ;;  %v1775_v11 = vsub.f32 %v1755_v55, %v1771_v10 }
 0xc1d   : > { %v1782_v12 = vmul.f32 1.442695, %v1775_v11 }
 0xc1e   : > { %v1857_v43 = vpop.permute.xlu1 %1856 }
 0xc1f   : > { %3093 = vpow2.f32 %v1782_v12  ;;  %v1862_v13 = vsel %vm881_vm3, %v1857_v43, 0 }
 0xc20   : > { %2920 = vmatpush3.bf16.msra.mxu0 %v1862_v13 }
 0xc21   : > { %2931 = vmatprep.subr.bf16.mxu0 %v3174_v9 }
 0xc24   : > { %v3090_v15 = vpop.eup %3089 }
 0xc25   : > { %v1787_v14 = vsel %vm634_vm2, %v3090_v15, 0.0 }
 0xc26   : > { %1788 = vadd.xlane.f32.xlu1 %v1787_v14 }
 0xc28   : > { %v3092_v16 = vpop.eup %3091 }
 0xc29   : > { %v1790_v18 = vsel %vm634_vm2, %v3092_v16, 0.0 }
 0xc2a   : > { %1791 = vadd.xlane.f32.xlu0 %v1790_v18 }
 0xc2c   : > { %v3094_v19 = vpop.eup %3093 }
 0xc2d   : > { %v1793_v24 = vsel %vm634_vm2, %v3094_v19, 0.0 }
 0xc2e   : > { %1794 = vadd.xlane.f32.xlu1 %v1793_v24 }
 0xc3f   : > { %1904 = vrot.lane.b32.xlu1 %v3572_v17, %s3837_s23 }
 0xc40   : > { %1952 = vrot.lane.b32.xlu0 %v3577_v22, %s3837_s23  ;;  %s2540_s23 = scalar_lea.sflag [#allocation3], %s494_s17 }
 0xc42   : > { %v1786_v25 = vpop.xlane.xlu0 %1785 }
 0xc43   : > { %3095 = vrcp.f32 %v1786_v25 }
 0xc46   : > { %v1809_v26 = vpop.permute.xlu0 %1808 }
 0xc47   : > { %v1814_v27 = vsel %vm881_vm3, %v1809_v26, 0 }
 0xc48   : > { %2914 = vmatpush3.bf16.msra.mxu1 %v1814_v27 }
 0xc49   : > { %2925 = vmatprep.subr.bf16.mxu1 %v3174_v9 }
 0xc50   : > { %v3096_v28 = vpop.eup %3095 }
 0xc51   : > { %v1800_v29 = vmul.f32 %v3096_v28, %v3088_v0  ;;  %v2104_v0 = vsel %vm881_vm3, %v2668_v60, 0  ;;  %v3678_v28 = vld [vmem:[%s3810_s8 + $0x8] sm:$0x3f] }
 0xc52   : > { %v2225_v60 = vrot.slane %v3678_v28, %v1292_v5  ;;  %v3057_v5 = vld [vmem:[%s3813_s11 + $0x28] sm:$0xff]  }
 0xc53   : > { %v1804_v31 = vpack.c.bf16 %v1800_v29, %v1800_v29 }
 0xc55   : > { %2916 = vmatmul.mubr.msk.bf16.vlgmr.msra.gmra.mxu1 %vm634_vm2, %v1804_v31 }
 0xc56   : > { %2927 = vmatprep.mubr.msk.bf16.mxu1 %vm3175_vm1, %v3174_v9 }
 0xcaf   : > { %v1789_v17 = vpop.xlane.xlu1 %1788 }
 0xcb0   : > { %3097 = vrcp.f32 %v1789_v17 }
 0xcb3   : > { %v1792_v32 = vpop.xlane.xlu0 %1791 }
 0xcb4   : > { %3099 = vrcp.f32 %v1792_v32 }
 0xcb7   : > { %v1795_v22 = vpop.xlane.xlu1 %1794  ;;  %v1953_v37 = vpop.permute.xlu0 %1952 }
 0xcb8   : > { %3101 = vrcp.f32 %v1795_v22  ;;  %v1958_v46 = vsel %vm881_vm3, %v1953_v37, 0  ;;  %v2198_v22 = vrot.slane %v3678_v28, %v3343_v21  ;;  %v3053_v21 = vld [vmem:[%s3811_s9 + $0x18] sm:$0xff]  }
 0xcbb   : > { %v1905_v33 = vpop.permute.xlu1 %1904 }
 0xcbc   : > { %v1910_v34 = vsel %vm881_vm3, %v1905_v33, 0 }
 0xcbd   : > { %v3098_v35 = vpop.eup %3097  ;;  %2926 = vmatpush3.bf16.msra.mxu1 %v1910_v34 }
 0xcbe   : > { %v1801_v36 = vmul.f32 %v3098_v35, %v3090_v15  ;;  %2937 = vmatprep.subr.bf16.mxu1 %v3174_v9 }
 0xcc0   : > { %v1805_v38 = vpack.c.bf16 %v1801_v36, %v1801_v36 }
 0xcc1   : > { %v3100_v41 = vpop.eup %3099 }
 0xcc2   : > { %2922 = vmatmul.mubr.msk.bf16.vlgmr.msra.gmra.mxu0 %vm634_vm2, %v1805_v38  ;;  %v1802_v47 = vmul.f32 %v3100_v41, %v3092_v16 }
 0xcc3   : > { %2932 = vmatpush3.bf16.msra.mxu0 %v1958_v46  ;;  %2933 = vmatprep.mubr.msk.bf16.mxu0 %vm3175_vm1, %v3174_v9 }
 0xcc4   : > { %v1806_v48 = vpack.c.bf16 %v1802_v47, %v1802_v47  ;;  %2943 = vmatprep.subr.bf16.mxu0 %v3174_v9 }
 0xcc5   : > { %v3102_v42 = vpop.eup %3101 }
 0xcc6   : > { %2928 = vmatmul.mubr.msk.bf16.vlgmr.msra.gmra.mxu1 %vm634_vm2, %v1806_v48  ;;  %v1803_v45 = vmul.f32 %v3102_v42, %v3094_v19  ;;  %v3054_v42 = vld [vmem:[%s3811_s9 + $0x10] sm:$0xff]  }
 0xcc7   : > { %2938 = vmatpush3.bf16.msra.mxu1 %v2011_v49  ;;  %2939 = vmatprep.mubr.msk.bf16.mxu1 %vm3175_vm1, %v3174_v9 }
 0xcc8   : > { %v1807_v40 = vpack.c.bf16 %v1803_v45, %v1803_v45  ;;  %2949 = vmatprep.subr.bf16.mxu1 %v3174_v9 }
 0xcca   : > { %2934 = vmatmul.mubr.msk.bf16.vlgmr.msra.gmra.mxu0 %vm634_vm2, %v1807_v40 }
 0xccb   : > { %2944 = vmatpush3.bf16.msra.mxu0 %v2057_v51  ;;  %2945 = vmatprep.mubr.msk.bf16.mxu0 %vm3175_vm1, %v3174_v9 }
 0xccc   : > { %2955 = vmatprep.subr.bf16.mxu0 %v3174_v9 }
 0xd15   : > { %v1850_v54 = vpop.f32.mrf.mxu1 }
 0xd16   : > { %v2005_v55 = vpack.c.bf16 %v1850_v54, %v1850_v54 }
 0xd17   : > { %v2917_v57 = vpop.f32.mrf.mxu1 }
 0xd18   : > { %2946 = vmatmul.mubr.msk.bf16.vlgmr.msra.gmra.mxu0 %vm634_vm2, %v2005_v55  ;;  %v2220_v57 = vrot.slane %v3678_v28, %v3349_v23  ;;  %v3056_v23 = vld [vmem:[%s3813_s11 + $0x30] sm:$0xff]  }
 0xd19   : > { %v1853_v58 = vpop.f32.mrf.mxu1  ;;  %2956 = vmatpush3.bf16.msra.mxu0 %v2152_v56  ;;  %2957 = vmatprep.mubr.msk.bf16.mxu0 %vm3175_vm1, %v3174_v9 }
 0xd1a   : > { %2969 = vmatprep.subr.bf16.mxu0 %v3174_v9 }
 0xd1b   : > { %v2918_v59 = vpop.f32.mrf.mxu1 }
 0xd82   : > { %v1898_v61 = vpop.f32.mrf.mxu0 }
 0xd83   : > { %v2006_v63 = vpack.c.bf16 %v1898_v61, %v1898_v61 }
 0xd84   : > { %v2923_v1 = vpop.f32.mrf.mxu0 }
 0xd85   : > { %2940 = vmatmul.mubr.msk.bf16.vlgmr.msra.gmra.mxu1 %vm634_vm2, %v2006_v63  ;;  %v3055_v1 = vld [vmem:[%s3813_s11 + $0x38] sm:$0xff]  }
 0xd86   : > { %v1901_v53 = vpop.f32.mrf.mxu0  ;;  %v1946_v2 = vpop.f32.mrf.mxu1  ;;  %2950 = vmatpush3.bf16.msra.mxu1 %v2104_v0  ;;  %2951 = vmatprep.mubr.msk.bf16.mxu1 %vm3175_vm1, %v3174_v9 }
 0xd87   : > { %2961 = vmatprep.subr.bf16.mxu1 %v3174_v9  ;;  %v2099_v10 = vpack.c.bf16 %v1946_v2, %v1946_v2  ;;  %v3058_v53 = vld [vmem:[%s3813_s11 + $0x20] sm:$0xff]  }
 0xd88   : > { %v2924_v3 = vpop.f32.mrf.mxu0  ;;  %v2929_v4 = vpop.f32.mrf.mxu1  ;;  %v2679_v2 = vld [vmem:[%s3812_s10 + $0x1] ss:$0 sm:$0xff] }
 0xd8a   : > { %v1949_v7 = vpop.f32.mrf.mxu1  ;;  %v1994_v8 = vpop.f32.mrf.mxu0 }
 0xd8b   : > { %v2147_v11 = vpack.c.bf16 %v1994_v8, %v1994_v8 }
 0xd8c   : > { %v2930_v12 = vpop.f32.mrf.mxu1  ;;  %v2935_v43 = vpop.f32.mrf.mxu0 }
 0xd8d   : > { %2952 = vmatmul.mubr.msk.bf16.vlgmr.msra.gmra.mxu1 %vm634_vm2, %v2099_v10  ;;  %2958 = vmatmul.mubr.msk.bf16.vlgmr.msra.gmra.mxu0 %vm634_vm2, %v2147_v11 }
 0xd8e   : > { %v1997_v13 = vpop.f32.mrf.mxu0  ;;  %2965 = vmatprep.mubr.msk.bf16.mxu1 %vm3175_vm1, %v3174_v9  ;;  %2977 = vmatprep.mubr.msk.bf16.mxu0 %vm3175_vm1, %v3174_v9 }
 0xd8f   : > { %2962 = vmatpush3.bf16.msra.mxu1 %v3053_v21  ;;  %2970 = vmatpush3.bf16.msra.mxu0 %v3055_v1  ;;  %v2406_v21 = vrot.slane %v3678_v28, %v1471_v30  ;;  %v3111_v30 = vld [vmem:[%s3806_s4] sm:$0x7] }
 0xd90   : > { %v2936_v15 = vpop.f32.mrf.mxu0  ;;  %2963 = vmatprep.subr.bf16.mxu1 %v3174_v9  ;;  %2971 = vmatprep.subr.bf16.mxu0 %v3174_v9 }
 0xd93   : > { %2964 = vmatpush3.bf16.msra.mxu1 %v3054_v42  ;;  %2972 = vmatpush3.bf16.msra.mxu0 %v3056_v23 }
 0xd94   : > { %2981 = vmatprep.subr.bf16.mxu1 %v3174_v9  ;;  %2973 = vmatprep.subr.bf16.mxu0 %v3174_v9 }
 0xd97   : > { %2974 = vmatpush3.bf16.msra.mxu0 %v3057_v5 }
 0xd98   : > { %2975 = vmatprep.subr.bf16.mxu0 %v3174_v9 }
 0xd9b   : > { %2976 = vmatpush3.bf16.msra.mxu0 %v3058_v53 }
 0xdd8   : > { %v2093_v14 = vpop.f32.mrf.mxu0 }
 0xdda   : > { %v2947_v16 = vpop.f32.mrf.mxu0 }
 0xddc   : > { %v2096_v18 = vpop.f32.mrf.mxu0 }
 0xdde   : > { %v2948_v19 = vpop.f32.mrf.mxu0 }
 0xe45   : > { %v2047_v24 = vpop.f32.mrf.mxu1 }
 0xe46   : > { %v2094_v29 = vadd.f32 %v2093_v14, %v2047_v24 }
 0xe47   : > { %v2941_v25 = vpop.f32.mrf.mxu1 }
 0xe48   : > { %v2318_v25 = vrot.slane %v3678_v28, %v1382_v39  ;;  %v3060_v39 = vld [vmem:[%s3814_s12] sm:$0xff]  }
 0xe49   : > { %v2050_v26 = vpop.f32.mrf.mxu1 }
 0xe4b   : > { %v2942_v27 = vpop.f32.mrf.mxu1 }
 0xe4d   : > { %v2140_v31 = vpop.f32.mrf.mxu1  ;;  %v2188_v17 = vpop.f32.mrf.mxu0 }
 0xe4e   : > { %v2146_v32 = vadd.f32 %v2140_v31, %v2094_v29 }
 0xe4f   : > { %v2953_v33 = vpop.f32.mrf.mxu1  ;;  %v2959_v34 = vpop.f32.mrf.mxu0 }
 0xe50   : > { %v2194_v35 = vadd.f32 %v2188_v17, %v2146_v32 }
 0xe51   : > { %v2143_v36 = vpop.f32.mrf.mxu1  ;;  %v2191_v37 = vpop.f32.mrf.mxu0 }
 0xe52   : > { %v2199_v38 = vadd.f32 %v2198_v22, %v2194_v35  ;;  %v3059_v35 = vld [vmem:[%s3814_s12 + $0x8] sm:$0xff]  }
 0xe53   : > { %v2954_v41 = vpop.f32.mrf.mxu1  ;;  %v2960_v44 = vpop.f32.mrf.mxu0 }
 0xe54   : > { %v2200_v46 = vadd.f32 %v2199_v38, %v3555_v6 }
 0xe56   : > { %v2201_v47 = vsel %vm514_vm0, %v2200_v46, 0.0  ;;  %v2205_v48 = vmul.f32 %v2200_v46, %v2200_v46 }
 0xe57   : > { %2202 = vadd.xlane.f32.xlu1 %v2201_v47 }
 0xe58   : > { %v2206_v49 = vsel %vm514_vm0, %v2205_v48, 0.0 }
 0xe59   : > { %2207 = vadd.xlane.f32.xlu0 %v2206_v49 }
 0xee0   : > { %v2203_v6 = vpop.xlane.xlu1 %2202 }
 0xee1   : > { %v2204_v50 = vmul.f32 0.03125, %v2203_v6 }
 0xee2   : > { %v2208_v45 = vpop.xlane.xlu0 %2207 }
 0xee3   : > { %v2210_v40 = vmul.f32 %v2204_v50, %v2204_v50  ;;  %v2209_v51 = vmul.f32 0.03125, %v2208_v45  ;;  %v2213_v56 = vsub.f32 %v2200_v46, %v2204_v50  ;;  %v2411_v50 = vrot.slane %v3678_v28, %v1476_v62 }
 0xee4   : > { %v2431_v62 = vrot.slane %v3111_v30, 2 }
 0xee5   : > { %v2211_v52 = vsub.f32 %v2209_v51, %v2210_v40 }
 0xee7   : > { %v2212_v54 = vmax.f32 %v2211_v52, 0.0  ;;  %v3061_v52 = vld [vmem:[%s3815_s13 + $0x8] sm:$0xff]  }
 0xee9   : > { %v2214_v55 = vadd.f32 1e-12, %v2212_v54 }
 0xeeb   : > { %3103 = vrsqrt.f32 %v2214_v55 }
 0xef8   : > { %v3104_v58 = vpop.eup %3103 }
 0xef9   : > { %v2216_v59 = vmul.f32 %v3104_v58, %v2213_v56 }
 0xefb   : > { %v2221_v61 = vmul.f32 %v2220_v57, %v2216_v59 }
 0xefd   : > { %v2226_v63 = vadd.f32 %v2225_v60, %v2221_v61 }
 0xeff   : > { %v2232_v0 = vpack.c.bf16 %v2226_v63, %v2226_v63 }
 0xf01   : > { %2966 = vmatmul.mubr.msk.bf16.vlgmr.msra.gmra.mxu1 %vm514_vm0, %v2232_v0 }
 0xf02   : > { %2985 = vmatprep.mubr.msk.bf16.mxu1 %vm3175_vm1, %v3174_v9  ;;  %2982 = vmatpush3.bf16.msra.mxu1 %v3059_v35 }
 0xf03   : > { %2983 = vmatprep.subr.bf16.mxu1 %v3174_v9 }
 0xf06   : > { %2984 = vmatpush3.bf16.msra.mxu1 %v3060_v39 }
 0xf07   : > { %2989 = vmatprep.subr.bf16.mxu1 %v3174_v9 }
 0xfc1   : > { %v2290_v3 = vpop.f32.mrf.mxu1 }
 0xfc2   : > { %v2291_v4 = vadd.f32 %v2679_v2, %v2290_v3 }
 0xfc3   : > { %v2967_v7 = vpop.f32.mrf.mxu1 }
 0xfc4   : > { %v2296_v8 = vmul.f32 %v2291_v4, %v2291_v4 }
 0xfc5   : > { %v2293_v10 = vpop.f32.mrf.mxu1 }
 0xfc6   : > { %v2297_v11 = vmul.f32 %v2296_v8, %v2291_v4 }
 0xfc7   : > { %v2968_v12 = vpop.f32.mrf.mxu1 }
 0xfc8   : > { %v2298_v43 = vmul.f32 0.044715, %v2297_v11 }
 0xfca   : > { %v2299_v13 = vadd.f32 %v2298_v43, %v2291_v4 }
 0xfcc   : > { %v2300_v15 = vmul.f32 0.7978846, %v2299_v13 }
 0xfce   : > { %3105 = vtanh.f32 %v2300_v15 }
 0xfdb   : > { %v3106_v14 = vpop.eup %3105 }
 0xfdc   : > { %v2302_v16 = vadd.f32 1.0, %v3106_v14 }
 0xfde   : > { %v2303_v18 = vmul.f32 0.5, %v2302_v16 }
 0xfe0   : > { %v2304_v19 = vmul.f32 %v2303_v18, %v2291_v4 }
 0xfe2   : > { %v2314_v24 = vpack.c.bf16 %v2304_v19, %v2304_v19 }
 0xfe4   : > { %2978 = vmatmul.mubr.msk.bf16.vlgmr.msra.gmra.mxu0 %vm1408_vm4, %v2314_v24 }
0x10a4   : > { %v2380_v26 = vpop.f32.mrf.mxu0 }
0x10a5   : > { %v2381_v27 = vadd.f32 %v2380_v26, %v2318_v25 }
0x10a6   : > { %v2979_v29 = vpop.f32.mrf.mxu0 }
0x10a7   : > { %v2386_v31 = vadd.f32 %v2381_v27, %v2226_v63 }
0x10a8   : > { %v2383_v17 = vpop.f32.mrf.mxu0 }
0x10a9   : > { %v2387_v32 = vsel %vm514_vm0, %v2386_v31, 0.0  ;;  %v2391_v22 = vmul.f32 %v2386_v31, %v2386_v31 }
0x10aa   : > { %2388 = vadd.xlane.f32.xlu0 %v2387_v32  ;;  %v2980_v33 = vpop.f32.mrf.mxu0 }
0x10ab   : > { %v2392_v34 = vsel %vm514_vm0, %v2391_v22, 0.0 }
0x10ac   : > { %2393 = vadd.xlane.f32.xlu1 %v2392_v34 }
0x1133   : > { %v2389_v36 = vpop.xlane.xlu0 %2388 }
0x1134   : > { %v2390_v37 = vmul.f32 0.03125, %v2389_v36 }
0x1135   : > { %v2394_v38 = vpop.xlane.xlu1 %2393 }
0x1136   : > { %v2396_v41 = vmul.f32 %v2390_v37, %v2390_v37  ;;  %v2395_v44 = vmul.f32 0.03125, %v2394_v38  ;;  %v2399_v49 = vsub.f32 %v2386_v31, %v2390_v37 }
0x1138   : > { %v2397_v46 = vsub.f32 %v2395_v44, %v2396_v41 }
0x113a   : > { %v2398_v47 = vmax.f32 %v2397_v46, 0.0 }
0x113c   : > { %v2400_v48 = vadd.f32 1e-12, %v2398_v47 }
0x113e   : > { %3107 = vrsqrt.f32 %v2400_v48 }
0x114b   : > { %v3108_v42 = vpop.eup %3107 }
0x114c   : > { %v2402_v6 = vmul.f32 %v3108_v42, %v2399_v49 }
0x114e   : > { %v2407_v45 = vmul.f32 %v2406_v21, %v2402_v6 }
0x1150   : > { %v2412_v40 = vadd.f32 %v2411_v50, %v2407_v45 }
0x1152   : > { %v2417_v51 = vpack.c.bf16 %v2412_v40, %v2412_v40 }
0x1154   : > { %2986 = vmatmul.mubr.msk.bf16.vlgmr.msra.gmra.mxu1 %vm514_vm0, %v2417_v51 }
0x1155   : > { %2993 = vmatprep.mubr.msk.bf16.mxu1 %vm3175_vm1, %v3174_v9  ;;  %2990 = vmatpush3.bf16.msra.mxu1 %v3061_v52 }
0x1156   : > { %2991 = vmatprep.subr.bf16.mxu1 %v3174_v9  ;;  %v2482_v9 = vld [vmem:[%s3816_s14] sm:$0x1] }
0x1159   : > { %2992 = vmatpush3.bf16.msra.mxu1 %v3062_v20 }
0x1214   : > { %v2470_v28 = vpop.f32.mrf.mxu1 }
0x1215   : > { %v2471_v54 = vadd.f32 %v2470_v28, %v2431_v62 }
0x1216   : > { %v2987_v55 = vpop.f32.mrf.mxu1 }
0x1217   : > { %3109 = vtanh.f32 %v2471_v54 }
0x1218   : > { %v2473_v56 = vpop.f32.mrf.mxu1 }
0x121a   : > { %v2988_v57 = vpop.f32.mrf.mxu1 }
0x1224   : > { %v3110_v58 = vpop.eup %3109 }
0x1225   : > { %v2481_v59 = vpack.c.bf16 %v3110_v58, %v3110_v58 }
0x1227   : > { %2994 = vmatmul.mubr.msk.bf16.vlgmr.msra.gmra.mxu1 %vm514_vm0, %v2481_v59 }
0x12e7   : > { %v2532_v60 = vpop.f32.mrf.mxu1 }
0x12e8   : > { %v2533_v61 = vadd.f32 %v2532_v60, %v2482_v9 }
0x12e9   : > { %v2995_v63 = vpop.f32.mrf.mxu1 }
0x12ea   : > { %2538 = vst [vmem:[%s495_s30] sm:$0x1] %v2533_v61 }
0x12eb   : > { %v2535_v0 = vpop.f32.mrf.mxu1 }
0x12ec   : > { %3125 = shalt.err (!%p3122_p3)
}
0x12ed   : > { %s3126_s24 = scalar_lea.hbm %s3761_s26, 16  ;;  %s3130_s25 = scalar_lea.hbm %s3817_s15, 32 }
0x12ee   : > { %p3127_p4 = scmp.ne.s32.totalorder %s3761_s26, %s3126_s24  ;;  %p3131_p9 = scmp.lt.s32.totalorder %s3761_s26, %s3817_s15 }
0x12ef   : > { %p3132_p10 = scmp.lt.s32.totalorder %s3130_s25, %s3126_s24 }
0x12f0   : > { %p3128_p7 = pnand %p3127_p4, %p3300_p5 }
0x12f1   : > { %p3133_p11 = por %p3132_p10, %p3131_p9 }
0x12f2   : > { %p3129_p8 = pneg %p3128_p7 }
0x12f4   : > { %p3134_p12 = pnand %p3133_p11, %p3129_p8 }
0x12f6   : > { %3137 = shalt.err (!%p3134_p12)
}
0x12f7   : > { %2997 = dma.vmem_to_hbm [thread:$0]  (%p3300_p5), %s3763_s27, 16, %s3761_s26, %s2540_s23   ;;  %v2996_v1 = vpop.f32.mrf.mxu1 }
0x12f8 PF: > { %p3003_p13 = scmp.ge.s32.totalorder %s3172_s21, 2  ;;  %s2564_s0 = sand.u32 1, %s3160_s18  }
0x12f9   : > { %s2565_s1 = scalar_lea.sflag [#allocation3], %s2564_s0 }
0x12fa   : > { %p3000_p0 = pnand %p3003_p13, %p3304_p6 }
0x12fc   : > { %p3001_p1 = pneg %p3000_p0 }
0x12fe   : > { %3155 = dma.done.wait (%p3001_p1), %s2565_s1, 16  }
0x12ff   : > { %3157 = vsyncadd (%p3001_p1), %s2565_s1, 4294967280  ;;  %s3838_s21 = sld [smem:[#allocation6_spill]]  ;;  %s3841_s18 = smov %s3164_s19 }
0x1300   : > { %s3839_s20 = sld [smem:[#allocation5_spill]] }
0x1301   : > { %s3840_s28 = sld [smem:[#allocation7_spill]] }
0x1305   : > { %p25_p2 = scmp.ge.s32.totalorder %s3838_s21, 4  }
0x1306   : > { %s3842_s19 = smov %s3839_s20 }
0x1307   : > { %s3843_s20 = smov %s3840_s28  ;;  %27 = sbr.rel (!%p25_p2) target bundleno = 6 (0x6), region = 125 }
0x130c   :  { %2569 = vsyncpa [#allocation3], 1 }
0x130d   :  { %2571 = vsyncpa [#allocation3 + $0x1], 1 }

</bundles_post_ra>
